<compile_context>
chip_gen: v6e
topology: v6e:2x2x1
jax: 0.10.0
libtpu: 0.0.40
codegen_flags: <defaults>
</compile_context>

<pallas_src>
import functools
import math

import jax
import jax.numpy as jnp
from jax.experimental import pallas as pl
from jax.experimental.pallas import tpu as pltpu


def transformer_block_kernel(num_heads, eps,
                             x_ref,                         # (1, S, E) f32
                             wqkv_ref, bqkv_ref,            # (E, 3E) bf16, (1, 3E) f32 (q-scale folded)
                             wo_ref, bo_ref,                # (E, E) bf16,  (1, E)  f32
                             g1_ref, be1_ref,               # (1, E) f32,   (1, E)  f32
                             w1_ref, b1_ref,                # (E, F) bf16,  (1, F)  f32
                             w2_ref, b2_ref,                # (F, E) bf16,  (1, E)  f32
                             g2_ref, be2_ref,               # (1, E) f32,   (1, E)  f32
                             out_ref):                      # (1, S, E) f32
    f32 = jnp.float32
    bf16 = jnp.bfloat16

    x = x_ref[0]                                            # (S, E) f32 -- residual path stays f32
    S, E = x.shape
    dh = E // num_heads

    # ---- fused QKV projection: one bf16 MXU pass, f32 accumulation ----
    qkv = jnp.dot(x.astype(bf16), wqkv_ref[...],
                  preferred_element_type=f32) + bqkv_ref[...]          # (S, 3E) f32

    # ---- head split (dh=4 lane groups; see TODO above for real-size layout) ----
    def split_heads(base):
        parts = [qkv[:, base + h * dh: base + (h + 1) * dh] for h in range(num_heads)]
        return jnp.stack(parts, axis=0).astype(bf16)        # (nh, S, dh) bf16 for the MXU

    q = split_heads(0)            # 1/sqrt(dh) already folded into the Q weight columns
    k = split_heads(E)
    v = split_heads(2 * E)

    # ---- batched multi-head attention over the head axis ----
    logits = jnp.einsum('hqd,hkd->hqk', q, k, preferred_element_type=f32)   # (nh, S, S) f32
    m = jnp.max(logits, axis=-1, keepdims=True)
    e = jnp.exp(logits - m)                                                  # f32 elementwise (EUP exp)
    denom = jnp.sum(e, axis=-1, keepdims=True)
    probs = (e * pl.reciprocal(denom, approx=True)).astype(bf16)             # EUP reciprocal, bf16 to MXU
    ctx = jnp.einsum('hqk,hkd->hqd', probs, v, preferred_element_type=f32)   # (nh, S, dh) f32

    ctx_flat = jnp.concatenate([ctx[h] for h in range(num_heads)], axis=-1)  # (S, E) f32
    attn = jnp.dot(ctx_flat.astype(bf16), wo_ref[...],
                   preferred_element_type=f32) + bo_ref[...]

    # ---- residual + LayerNorm1 (f32 VPU math; dropout identity in eval) ----
    y = x + attn
    mu = jnp.mean(y, axis=-1, keepdims=True)
    var = jnp.mean(jnp.square(y - mu), axis=-1, keepdims=True)
    y = (y - mu) * jax.lax.rsqrt(var + eps) * g1_ref[...] + be1_ref[...]

    # ---- feed-forward: Linear -> ReLU -> (Dropout=id) -> Linear (bf16 MXU, f32 acc) ----
    h1 = jnp.dot(y.astype(bf16), w1_ref[...], preferred_element_type=f32) + b1_ref[...]
    h1 = jnp.maximum(h1, 0.0)
    ff = jnp.dot(h1.astype(bf16), w2_ref[...], preferred_element_type=f32) + b2_ref[...]

    # ---- residual + LayerNorm2 ----
    z = y + ff
    mu2 = jnp.mean(z, axis=-1, keepdims=True)
    var2 = jnp.mean(jnp.square(z - mu2), axis=-1, keepdims=True)
    z = (z - mu2) * jax.lax.rsqrt(var2 + eps) * g2_ref[...] + be2_ref[...]

    out_ref[...] = z.reshape(1, S, E)


def transformer_block(x, params, num_heads=8, eps=1e-5):
    B, S, E = x.shape
    F = params['fc1_w'].shape[0]
    dh = E // num_heads
    scale = 1.0 / math.sqrt(dh)
    f32, bf16 = jnp.float32, jnp.bfloat16

    # Host-side (free) prep: fold q-scaling into the packed in_proj, pre-transpose every
    # weight, and cast weights to bf16 for the MXU. Biases / LN params stay f32.
    q_scale = jnp.concatenate([jnp.full((E,), scale, f32), jnp.ones((2 * E,), f32)])
    wqkv_t = ((params['in_proj_w'] * q_scale[:, None]).T).astype(bf16)       # (E, 3E)
    bqkv = (params['in_proj_b'] * q_scale).reshape(1, 3 * E).astype(f32)

    inputs = (
        x.astype(f32),
        wqkv_t, bqkv,
        params['out_proj_w'].T.astype(bf16), params['out_proj_b'].reshape(1, E).astype(f32),
        params['ln1_g'].reshape(1, E).astype(f32), params['ln1_b'].reshape(1, E).astype(f32),
        params['fc1_w'].T.astype(bf16), params['fc1_b'].reshape(1, F).astype(f32),
        params['fc2_w'].T.astype(bf16), params['fc2_b'].reshape(1, E).astype(f32),
        params['ln2_g'].reshape(1, E).astype(f32), params['ln2_b'].reshape(1, E).astype(f32),
    )

    const2d = lambda b: (0, 0)     # weights / params: fetched once, VMEM-resident across the grid
    in_specs = [
        pl.BlockSpec((1, S, E), lambda b: (b, 0, 0)),      # x: streamed per batch block
        pl.BlockSpec((E, 3 * E), const2d), pl.BlockSpec((1, 3 * E), const2d),
        pl.BlockSpec((E, E), const2d), pl.BlockSpec((1, E), const2d),
        pl.BlockSpec((1, E), const2d), pl.BlockSpec((1, E), const2d),
        pl.BlockSpec((E, F), const2d), pl.BlockSpec((1, F), const2d),
        pl.BlockSpec((F, E), const2d), pl.BlockSpec((1, E), const2d),
        pl.BlockSpec((1, E), const2d), pl.BlockSpec((1, E), const2d),
    ]
    out_specs = pl.BlockSpec((1, S, E), lambda b: (b, 0, 0))

    return pl.pallas_call(
        functools.partial(transformer_block_kernel, num_heads, eps),
        out_shape=jax.ShapeDtypeStruct((B, S, E), f32),
        grid=(B,),
        in_specs=in_specs,
        out_specs=out_specs,
        compiler_params=pltpu.CompilerParams(
            dimension_semantics=("parallel",),            # shards across v7x's 2 TensorCores
            vmem_limit_bytes=32 * 1024 * 1024),
    )(*inputs)


def init_params(key, d_model, d_ff):
    """Deterministic synthetic parameters with PyTorch-like init."""
    E = d_model

    def u(k, shape, bound):
        return jax.random.uniform(k, shape, jnp.float32, -bound, bound)

    ks = jax.random.split(key, 6)
    kE = 1.0 / math.sqrt(E)
    kF = 1.0 / math.sqrt(d_ff)
    return dict(
        in_proj_w=u(ks[0], (3 * E, E), math.sqrt(6.0 / (4 * E))),   # xavier-uniform-ish
        in_proj_b=jnp.zeros((3 * E,), jnp.float32),
        out_proj_w=u(ks[1], (E, E), kE),
        out_proj_b=jnp.zeros((E,), jnp.float32),
        ln1_g=jnp.ones((E,), jnp.float32),
        ln1_b=jnp.zeros((E,), jnp.float32),
        fc1_w=u(ks[2], (d_ff, E), kE),
        fc1_b=u(ks[3], (d_ff,), kE),
        fc2_w=u(ks[4], (E, d_ff), kF),
        fc2_b=u(ks[5], (E,), kF),
        ln2_g=jnp.ones((E,), jnp.float32),
        ln2_b=jnp.zeros((E,), jnp.float32),
    )


def reference(x, params, num_heads, eps=1e-5):
    """Pure-JAX f32 reference matching PyTorch TransformerBlock.forward (eval mode)."""
    B, S, E = x.shape
    dh = E // num_heads
    flat = x.reshape(B * S, E)
    qkv = flat @ params['in_proj_w'].T + params['in_proj_b']
    q, k, v = qkv[:, :E], qkv[:, E:2 * E], qkv[:, 2 * E:]
    q = q.reshape(B, S, num_heads, dh).transpose(0, 2, 1, 3)
    k = k.reshape(B, S, num_heads, dh).transpose(0, 2, 1, 3)
    v = v.reshape(B, S, num_heads, dh).transpose(0, 2, 1, 3)
    logits = jnp.einsum('bhqd,bhkd->bhqk', q, k) / math.sqrt(dh)
    probs = jax.nn.softmax(logits, axis=-1)
    ctx = jnp.einsum('bhqk,bhkd->bhqd', probs, v).transpose(0, 2, 1, 3).reshape(B * S, E)
    attn = ctx @ params['out_proj_w'].T + params['out_proj_b']

    def ln(y, g, b):
        mu = y.mean(-1, keepdims=True)
        var = ((y - mu) ** 2).mean(-1, keepdims=True)
        return (y - mu) * jax.lax.rsqrt(var + eps) * g + b

    y = ln(flat + attn, params['ln1_g'], params['ln1_b'])
    h = jnp.maximum(y @ params['fc1_w'].T + params['fc1_b'], 0.0)
    z = ln(y + (h @ params['fc2_w'].T + params['fc2_b']), params['ln2_g'], params['ln2_b'])
    return z.reshape(B, S, E)


if __name__ == "__main__":
    B, S, E = 2, 8, 32            # batch, seq_len, d_model (n_heads=8 -> head_dim=4)
    n_heads, d_ff = 8, 64
    key = jax.random.PRNGKey(0)
    kx, kp = jax.random.split(key)
    x = jax.random.normal(kx, (B, S, E), jnp.float32)
    params = init_params(kp, E, d_ff)

    out = jax.block_until_ready(transformer_block(x, params, num_heads=n_heads))
    assert out.shape == (B, S, E) and out.dtype == jnp.float32

    ref = jax.block_until_ready(reference(x, params, n_heads))
    max_err = float(jnp.max(jnp.abs(out - ref)))
    # Tolerance widened vs the f32 kernel: MXU operands are now bf16 (per perf review),
    # so the comparison against the pure-f32 reference carries bf16 rounding (~1e-2).
    assert max_err < 5e-2, f"mismatch vs f32 reference: {max_err}"
    print("KERNEL_OK")
</pallas_src>

<mosaic_0001>
module attributes {stable_mosaic.version = 11 : i64} {
  func.func @transformer_block_kernel(%arg0: i32, %arg1: memref<1x8x32xf32, #tpu.memory_space<vmem>>, %arg2: memref<32x96xbf16, #tpu.memory_space<vmem>>, %arg3: memref<1x96xf32, #tpu.memory_space<vmem>>, %arg4: memref<32x32xbf16, #tpu.memory_space<vmem>>, %arg5: memref<1x32xf32, #tpu.memory_space<vmem>>, %arg6: memref<1x32xf32, #tpu.memory_space<vmem>>, %arg7: memref<1x32xf32, #tpu.memory_space<vmem>>, %arg8: memref<32x64xbf16, #tpu.memory_space<vmem>>, %arg9: memref<1x64xf32, #tpu.memory_space<vmem>>, %arg10: memref<64x32xbf16, #tpu.memory_space<vmem>>, %arg11: memref<1x32xf32, #tpu.memory_space<vmem>>, %arg12: memref<1x32xf32, #tpu.memory_space<vmem>>, %arg13: memref<1x32xf32, #tpu.memory_space<vmem>>, %arg14: memref<1x8x32xf32, #tpu.memory_space<vmem>>) attributes {dimension_semantics = [#tpu.dimension_semantics<parallel>], iteration_bounds = array<i64: 2>, scalar_prefetch = 0 : i64, scratch_operands = 0 : i64, tpu.core_type = #tpu.core_type<tc>, window_params = [{transform_indices = @transform_0, window_bounds = array<i64: 1, 8, 32>}, {pipeline_mode = #tpu.pipeline_mode<synchronous>, transform_indices = @transform_1, window_bounds = array<i64: 32, 96>}, {pipeline_mode = #tpu.pipeline_mode<synchronous>, transform_indices = @transform_2, window_bounds = array<i64: 1, 96>}, {pipeline_mode = #tpu.pipeline_mode<synchronous>, transform_indices = @transform_3, window_bounds = array<i64: 32, 32>}, {pipeline_mode = #tpu.pipeline_mode<synchronous>, transform_indices = @transform_4, window_bounds = array<i64: 1, 32>}, {pipeline_mode = #tpu.pipeline_mode<synchronous>, transform_indices = @transform_5, window_bounds = array<i64: 1, 32>}, {pipeline_mode = #tpu.pipeline_mode<synchronous>, transform_indices = @transform_6, window_bounds = array<i64: 1, 32>}, {pipeline_mode = #tpu.pipeline_mode<synchronous>, transform_indices = @transform_7, window_bounds = array<i64: 32, 64>}, {pipeline_mode = #tpu.pipeline_mode<synchronous>, transform_indices = @transform_8, window_bounds = array<i64: 1, 64>}, {pipeline_mode = #tpu.pipeline_mode<synchronous>, transform_indices = @transform_9, window_bounds = array<i64: 64, 32>}, {pipeline_mode = #tpu.pipeline_mode<synchronous>, transform_indices = @transform_10, window_bounds = array<i64: 1, 32>}, {pipeline_mode = #tpu.pipeline_mode<synchronous>, transform_indices = @transform_11, window_bounds = array<i64: 1, 32>}, {pipeline_mode = #tpu.pipeline_mode<synchronous>, transform_indices = @transform_12, window_bounds = array<i64: 1, 32>}, {transform_indices = @transform_13, window_bounds = array<i64: 1, 8, 32>}]} {
    %c0 = arith.constant 0 : index
    %c0_0 = arith.constant 0 : index
    %c0_1 = arith.constant 0 : index
    %0 = vector.load %arg1[%c0, %c0_0, %c0_1] : memref<1x8x32xf32, #tpu.memory_space<vmem>>, vector<1x8x32xf32>
    %1 = vector.shape_cast %0 : vector<1x8x32xf32> to vector<8x32xf32>
    %2 = arith.truncf %1 : vector<8x32xf32> to vector<8x32xbf16>
    %c0_2 = arith.constant 0 : index
    %c0_3 = arith.constant 0 : index
    %3 = vector.load %arg2[%c0_2, %c0_3] : memref<32x96xbf16, #tpu.memory_space<vmem>>, vector<32x96xbf16>
    %cst = arith.constant dense<0.000000e+00> : vector<8x96xf32>
    %4 = tpu.matmul %2, %3, %cst {dimension_numbers = #tpu.dot_dimension_numbers<[1], [0], [0], [1], [0, 0, 1, 1], [], []>} : vector<8x32xbf16>, vector<32x96xbf16>, vector<8x96xf32> -> vector<8x96xf32>
    %c0_4 = arith.constant 0 : index
    %c0_5 = arith.constant 0 : index
    %5 = vector.load %arg3[%c0_4, %c0_5] : memref<1x96xf32, #tpu.memory_space<vmem>>, vector<1x96xf32>
    %6 = vector.broadcast %5 : vector<1x96xf32> to vector<8x96xf32>
    %7 = arith.addf %4, %6 : vector<8x96xf32>
    %8 = vector.extract_strided_slice %7 {offsets = [0, 0], sizes = [8, 4], strides = [1, 1]} : vector<8x96xf32> to vector<8x4xf32>
    %9 = vector.extract_strided_slice %7 {offsets = [0, 4], sizes = [8, 4], strides = [1, 1]} : vector<8x96xf32> to vector<8x4xf32>
    %10 = vector.extract_strided_slice %7 {offsets = [0, 8], sizes = [8, 4], strides = [1, 1]} : vector<8x96xf32> to vector<8x4xf32>
    %11 = vector.extract_strided_slice %7 {offsets = [0, 12], sizes = [8, 4], strides = [1, 1]} : vector<8x96xf32> to vector<8x4xf32>
    %12 = vector.extract_strided_slice %7 {offsets = [0, 16], sizes = [8, 4], strides = [1, 1]} : vector<8x96xf32> to vector<8x4xf32>
    %13 = vector.extract_strided_slice %7 {offsets = [0, 20], sizes = [8, 4], strides = [1, 1]} : vector<8x96xf32> to vector<8x4xf32>
    %14 = vector.extract_strided_slice %7 {offsets = [0, 24], sizes = [8, 4], strides = [1, 1]} : vector<8x96xf32> to vector<8x4xf32>
    %15 = vector.extract_strided_slice %7 {offsets = [0, 28], sizes = [8, 4], strides = [1, 1]} : vector<8x96xf32> to vector<8x4xf32>
    %16 = vector.shape_cast %8 : vector<8x4xf32> to vector<1x8x4xf32>
    %17 = vector.shape_cast %9 : vector<8x4xf32> to vector<1x8x4xf32>
    %18 = vector.shape_cast %10 : vector<8x4xf32> to vector<1x8x4xf32>
    %19 = vector.shape_cast %11 : vector<8x4xf32> to vector<1x8x4xf32>
    %20 = vector.shape_cast %12 : vector<8x4xf32> to vector<1x8x4xf32>
    %21 = vector.shape_cast %13 : vector<8x4xf32> to vector<1x8x4xf32>
    %22 = vector.shape_cast %14 : vector<8x4xf32> to vector<1x8x4xf32>
    %23 = vector.shape_cast %15 : vector<8x4xf32> to vector<1x8x4xf32>
    %24 = tpu.concatenate %16, %17, %18, %19, %20, %21, %22, %23 in 0 : vector<1x8x4xf32>, vector<1x8x4xf32>, vector<1x8x4xf32>, vector<1x8x4xf32>, vector<1x8x4xf32>, vector<1x8x4xf32>, vector<1x8x4xf32>, vector<1x8x4xf32> -> vector<8x8x4xf32>
    %25 = arith.truncf %24 : vector<8x8x4xf32> to vector<8x8x4xbf16>
    %26 = vector.extract_strided_slice %7 {offsets = [0, 32], sizes = [8, 4], strides = [1, 1]} : vector<8x96xf32> to vector<8x4xf32>
    %27 = vector.extract_strided_slice %7 {offsets = [0, 36], sizes = [8, 4], strides = [1, 1]} : vector<8x96xf32> to vector<8x4xf32>
    %28 = vector.extract_strided_slice %7 {offsets = [0, 40], sizes = [8, 4], strides = [1, 1]} : vector<8x96xf32> to vector<8x4xf32>
    %29 = vector.extract_strided_slice %7 {offsets = [0, 44], sizes = [8, 4], strides = [1, 1]} : vector<8x96xf32> to vector<8x4xf32>
    %30 = vector.extract_strided_slice %7 {offsets = [0, 48], sizes = [8, 4], strides = [1, 1]} : vector<8x96xf32> to vector<8x4xf32>
    %31 = vector.extract_strided_slice %7 {offsets = [0, 52], sizes = [8, 4], strides = [1, 1]} : vector<8x96xf32> to vector<8x4xf32>
    %32 = vector.extract_strided_slice %7 {offsets = [0, 56], sizes = [8, 4], strides = [1, 1]} : vector<8x96xf32> to vector<8x4xf32>
    %33 = vector.extract_strided_slice %7 {offsets = [0, 60], sizes = [8, 4], strides = [1, 1]} : vector<8x96xf32> to vector<8x4xf32>
    %34 = vector.shape_cast %26 : vector<8x4xf32> to vector<1x8x4xf32>
    %35 = vector.shape_cast %27 : vector<8x4xf32> to vector<1x8x4xf32>
    %36 = vector.shape_cast %28 : vector<8x4xf32> to vector<1x8x4xf32>
    %37 = vector.shape_cast %29 : vector<8x4xf32> to vector<1x8x4xf32>
    %38 = vector.shape_cast %30 : vector<8x4xf32> to vector<1x8x4xf32>
    %39 = vector.shape_cast %31 : vector<8x4xf32> to vector<1x8x4xf32>
    %40 = vector.shape_cast %32 : vector<8x4xf32> to vector<1x8x4xf32>
    %41 = vector.shape_cast %33 : vector<8x4xf32> to vector<1x8x4xf32>
    %42 = tpu.concatenate %34, %35, %36, %37, %38, %39, %40, %41 in 0 : vector<1x8x4xf32>, vector<1x8x4xf32>, vector<1x8x4xf32>, vector<1x8x4xf32>, vector<1x8x4xf32>, vector<1x8x4xf32>, vector<1x8x4xf32>, vector<1x8x4xf32> -> vector<8x8x4xf32>
    %43 = arith.truncf %42 : vector<8x8x4xf32> to vector<8x8x4xbf16>
    %44 = vector.extract_strided_slice %7 {offsets = [0, 64], sizes = [8, 4], strides = [1, 1]} : vector<8x96xf32> to vector<8x4xf32>
    %45 = vector.extract_strided_slice %7 {offsets = [0, 68], sizes = [8, 4], strides = [1, 1]} : vector<8x96xf32> to vector<8x4xf32>
    %46 = vector.extract_strided_slice %7 {offsets = [0, 72], sizes = [8, 4], strides = [1, 1]} : vector<8x96xf32> to vector<8x4xf32>
    %47 = vector.extract_strided_slice %7 {offsets = [0, 76], sizes = [8, 4], strides = [1, 1]} : vector<8x96xf32> to vector<8x4xf32>
    %48 = vector.extract_strided_slice %7 {offsets = [0, 80], sizes = [8, 4], strides = [1, 1]} : vector<8x96xf32> to vector<8x4xf32>
    %49 = vector.extract_strided_slice %7 {offsets = [0, 84], sizes = [8, 4], strides = [1, 1]} : vector<8x96xf32> to vector<8x4xf32>
    %50 = vector.extract_strided_slice %7 {offsets = [0, 88], sizes = [8, 4], strides = [1, 1]} : vector<8x96xf32> to vector<8x4xf32>
    %51 = vector.extract_strided_slice %7 {offsets = [0, 92], sizes = [8, 4], strides = [1, 1]} : vector<8x96xf32> to vector<8x4xf32>
    %52 = vector.shape_cast %44 : vector<8x4xf32> to vector<1x8x4xf32>
    %53 = vector.shape_cast %45 : vector<8x4xf32> to vector<1x8x4xf32>
    %54 = vector.shape_cast %46 : vector<8x4xf32> to vector<1x8x4xf32>
    %55 = vector.shape_cast %47 : vector<8x4xf32> to vector<1x8x4xf32>
    %56 = vector.shape_cast %48 : vector<8x4xf32> to vector<1x8x4xf32>
    %57 = vector.shape_cast %49 : vector<8x4xf32> to vector<1x8x4xf32>
    %58 = vector.shape_cast %50 : vector<8x4xf32> to vector<1x8x4xf32>
    %59 = vector.shape_cast %51 : vector<8x4xf32> to vector<1x8x4xf32>
    %60 = tpu.concatenate %52, %53, %54, %55, %56, %57, %58, %59 in 0 : vector<1x8x4xf32>, vector<1x8x4xf32>, vector<1x8x4xf32>, vector<1x8x4xf32>, vector<1x8x4xf32>, vector<1x8x4xf32>, vector<1x8x4xf32>, vector<1x8x4xf32> -> vector<8x8x4xf32>
    %61 = arith.truncf %60 : vector<8x8x4xf32> to vector<8x8x4xbf16>
    "tpu.trace_start"() <{level = 10 : i32, message = "hqd,hkd->hqk"}> : () -> ()
    %cst_6 = arith.constant dense<0.000000e+00> : vector<8x8x8xf32>
    %62 = tpu.matmul %25, %43, %cst_6 {dimension_numbers = #tpu.dot_dimension_numbers<[2], [2], [1], [1], [0, 0, 0, 1, 1, 1], [0], [0]>} : vector<8x8x4xbf16>, vector<8x8x4xbf16>, vector<8x8x8xf32> -> vector<8x8x8xf32>
    "tpu.trace_stop"() : () -> ()
    %cst_7 = arith.constant dense<0xFF800000> : vector<8x8xf32>
    %63 = vector.multi_reduction <maximumf>, %62, %cst_7 [2] : vector<8x8x8xf32> to vector<8x8xf32>
    %64 = vector.shape_cast %63 : vector<8x8xf32> to vector<8x8x1xf32>
    %65 = vector.broadcast %64 : vector<8x8x1xf32> to vector<8x8x8xf32>
    %66 = arith.subf %62, %65 : vector<8x8x8xf32>
    %67 = math.exp %66 : vector<8x8x8xf32>
    %cst_8 = arith.constant dense<0.000000e+00> : vector<8x8xf32>
    %68 = vector.multi_reduction <add>, %67, %cst_8 [2] : vector<8x8x8xf32> to vector<8x8xf32>
    %69 = vector.shape_cast %68 : vector<8x8xf32> to vector<8x8x1xf32>
    %70 = tpu.reciprocal %69 {approx = true} : vector<8x8x1xf32> -> vector<8x8x1xf32>
    %71 = vector.broadcast %70 : vector<8x8x1xf32> to vector<8x8x8xf32>
    %72 = arith.mulf %67, %71 : vector<8x8x8xf32>
    %73 = arith.truncf %72 : vector<8x8x8xf32> to vector<8x8x8xbf16>
    "tpu.trace_start"() <{level = 10 : i32, message = "hqk,hkd->hqd"}> : () -> ()
    %cst_9 = arith.constant dense<0.000000e+00> : vector<8x8x4xf32>
    %74 = tpu.matmul %73, %61, %cst_9 {dimension_numbers = #tpu.dot_dimension_numbers<[2], [1], [1], [2], [0, 0, 0, 1, 1, 2], [0], [0]>} : vector<8x8x8xbf16>, vector<8x8x4xbf16>, vector<8x8x4xf32> -> vector<8x8x4xf32>
    "tpu.trace_stop"() : () -> ()
    %75 = vector.extract_strided_slice %74 {offsets = [0, 0, 0], sizes = [1, 8, 4], strides = [1, 1, 1]} : vector<8x8x4xf32> to vector<1x8x4xf32>
    %76 = vector.shape_cast %75 : vector<1x8x4xf32> to vector<8x4xf32>
    %77 = vector.extract_strided_slice %74 {offsets = [1, 0, 0], sizes = [1, 8, 4], strides = [1, 1, 1]} : vector<8x8x4xf32> to vector<1x8x4xf32>
    %78 = vector.shape_cast %77 : vector<1x8x4xf32> to vector<8x4xf32>
    %79 = vector.extract_strided_slice %74 {offsets = [2, 0, 0], sizes = [1, 8, 4], strides = [1, 1, 1]} : vector<8x8x4xf32> to vector<1x8x4xf32>
    %80 = vector.shape_cast %79 : vector<1x8x4xf32> to vector<8x4xf32>
    %81 = vector.extract_strided_slice %74 {offsets = [3, 0, 0], sizes = [1, 8, 4], strides = [1, 1, 1]} : vector<8x8x4xf32> to vector<1x8x4xf32>
    %82 = vector.shape_cast %81 : vector<1x8x4xf32> to vector<8x4xf32>
    %83 = vector.extract_strided_slice %74 {offsets = [4, 0, 0], sizes = [1, 8, 4], strides = [1, 1, 1]} : vector<8x8x4xf32> to vector<1x8x4xf32>
    %84 = vector.shape_cast %83 : vector<1x8x4xf32> to vector<8x4xf32>
    %85 = vector.extract_strided_slice %74 {offsets = [5, 0, 0], sizes = [1, 8, 4], strides = [1, 1, 1]} : vector<8x8x4xf32> to vector<1x8x4xf32>
    %86 = vector.shape_cast %85 : vector<1x8x4xf32> to vector<8x4xf32>
    %87 = vector.extract_strided_slice %74 {offsets = [6, 0, 0], sizes = [1, 8, 4], strides = [1, 1, 1]} : vector<8x8x4xf32> to vector<1x8x4xf32>
    %88 = vector.shape_cast %87 : vector<1x8x4xf32> to vector<8x4xf32>
    %89 = vector.extract_strided_slice %74 {offsets = [7, 0, 0], sizes = [1, 8, 4], strides = [1, 1, 1]} : vector<8x8x4xf32> to vector<1x8x4xf32>
    %90 = vector.shape_cast %89 : vector<1x8x4xf32> to vector<8x4xf32>
    %91 = tpu.concatenate %76, %78, %80, %82, %84, %86, %88, %90 in 1 : vector<8x4xf32>, vector<8x4xf32>, vector<8x4xf32>, vector<8x4xf32>, vector<8x4xf32>, vector<8x4xf32>, vector<8x4xf32>, vector<8x4xf32> -> vector<8x32xf32>
    %92 = arith.truncf %91 : vector<8x32xf32> to vector<8x32xbf16>
    %c0_10 = arith.constant 0 : index
    %c0_11 = arith.constant 0 : index
    %93 = vector.load %arg4[%c0_10, %c0_11] : memref<32x32xbf16, #tpu.memory_space<vmem>>, vector<32x32xbf16>
    %cst_12 = arith.constant dense<0.000000e+00> : vector<8x32xf32>
    %94 = tpu.matmul %92, %93, %cst_12 {dimension_numbers = #tpu.dot_dimension_numbers<[1], [0], [0], [1], [0, 0, 1, 1], [], []>} : vector<8x32xbf16>, vector<32x32xbf16>, vector<8x32xf32> -> vector<8x32xf32>
    %c0_13 = arith.constant 0 : index
    %c0_14 = arith.constant 0 : index
    %95 = vector.load %arg5[%c0_13, %c0_14] : memref<1x32xf32, #tpu.memory_space<vmem>>, vector<1x32xf32>
    %96 = vector.broadcast %95 : vector<1x32xf32> to vector<8x32xf32>
    %97 = arith.addf %94, %96 : vector<8x32xf32>
    %98 = arith.addf %1, %97 : vector<8x32xf32>
    %cst_15 = arith.constant dense<0.000000e+00> : vector<8xf32>
    %99 = vector.multi_reduction <add>, %98, %cst_15 [1] : vector<8x32xf32> to vector<8xf32>
    %100 = vector.shape_cast %99 : vector<8xf32> to vector<8x1xf32>
    %cst_16 = arith.constant 3.200000e+01 : f32
    %101 = vector.broadcast %cst_16 : f32 to vector<8x1xf32>
    %102 = arith.divf %100, %101 : vector<8x1xf32>
    %103 = vector.broadcast %102 : vector<8x1xf32> to vector<8x32xf32>
    %104 = arith.subf %98, %103 : vector<8x32xf32>
    %105 = arith.mulf %104, %104 : vector<8x32xf32>
    %cst_17 = arith.constant dense<0.000000e+00> : vector<8xf32>
    %106 = vector.multi_reduction <add>, %105, %cst_17 [1] : vector<8x32xf32> to vector<8xf32>
    %107 = vector.shape_cast %106 : vector<8xf32> to vector<8x1xf32>
    %cst_18 = arith.constant 3.200000e+01 : f32
    %108 = vector.broadcast %cst_18 : f32 to vector<8x1xf32>
    %109 = arith.divf %107, %108 : vector<8x1xf32>
    %110 = vector.broadcast %102 : vector<8x1xf32> to vector<8x32xf32>
    %111 = arith.subf %98, %110 : vector<8x32xf32>
    %cst_19 = arith.constant 9.99999974E-6 : f32
    %112 = vector.broadcast %cst_19 : f32 to vector<8x1xf32>
    %113 = arith.addf %109, %112 : vector<8x1xf32>
    %114 = math.rsqrt %113 : vector<8x1xf32>
    %115 = vector.broadcast %114 : vector<8x1xf32> to vector<8x32xf32>
    %116 = arith.mulf %111, %115 : vector<8x32xf32>
    %c0_20 = arith.constant 0 : index
    %c0_21 = arith.constant 0 : index
    %117 = vector.load %arg6[%c0_20, %c0_21] : memref<1x32xf32, #tpu.memory_space<vmem>>, vector<1x32xf32>
    %118 = vector.broadcast %117 : vector<1x32xf32> to vector<8x32xf32>
    %119 = arith.mulf %116, %118 : vector<8x32xf32>
    %c0_22 = arith.constant 0 : index
    %c0_23 = arith.constant 0 : index
    %120 = vector.load %arg7[%c0_22, %c0_23] : memref<1x32xf32, #tpu.memory_space<vmem>>, vector<1x32xf32>
    %121 = vector.broadcast %120 : vector<1x32xf32> to vector<8x32xf32>
    %122 = arith.addf %119, %121 : vector<8x32xf32>
    %123 = arith.truncf %122 : vector<8x32xf32> to vector<8x32xbf16>
    %c0_24 = arith.constant 0 : index
    %c0_25 = arith.constant 0 : index
    %124 = vector.load %arg8[%c0_24, %c0_25] : memref<32x64xbf16, #tpu.memory_space<vmem>>, vector<32x64xbf16>
    %cst_26 = arith.constant dense<0.000000e+00> : vector<8x64xf32>
    %125 = tpu.matmul %123, %124, %cst_26 {dimension_numbers = #tpu.dot_dimension_numbers<[1], [0], [0], [1], [0, 0, 1, 1], [], []>} : vector<8x32xbf16>, vector<32x64xbf16>, vector<8x64xf32> -> vector<8x64xf32>
    %c0_27 = arith.constant 0 : index
    %c0_28 = arith.constant 0 : index
    %126 = vector.load %arg9[%c0_27, %c0_28] : memref<1x64xf32, #tpu.memory_space<vmem>>, vector<1x64xf32>
    %127 = vector.broadcast %126 : vector<1x64xf32> to vector<8x64xf32>
    %128 = arith.addf %125, %127 : vector<8x64xf32>
    %cst_29 = arith.constant 0.000000e+00 : f32
    %129 = vector.broadcast %cst_29 : f32 to vector<8x64xf32>
    %130 = arith.maximumf %128, %129 : vector<8x64xf32>
    %131 = arith.truncf %130 : vector<8x64xf32> to vector<8x64xbf16>
    %c0_30 = arith.constant 0 : index
    %c0_31 = arith.constant 0 : index
    %132 = vector.load %arg10[%c0_30, %c0_31] : memref<64x32xbf16, #tpu.memory_space<vmem>>, vector<64x32xbf16>
    %cst_32 = arith.constant dense<0.000000e+00> : vector<8x32xf32>
    %133 = tpu.matmul %131, %132, %cst_32 {dimension_numbers = #tpu.dot_dimension_numbers<[1], [0], [0], [1], [0, 0, 1, 1], [], []>} : vector<8x64xbf16>, vector<64x32xbf16>, vector<8x32xf32> -> vector<8x32xf32>
    %c0_33 = arith.constant 0 : index
    %c0_34 = arith.constant 0 : index
    %134 = vector.load %arg11[%c0_33, %c0_34] : memref<1x32xf32, #tpu.memory_space<vmem>>, vector<1x32xf32>
    %135 = vector.broadcast %134 : vector<1x32xf32> to vector<8x32xf32>
    %136 = arith.addf %133, %135 : vector<8x32xf32>
    %137 = arith.addf %122, %136 : vector<8x32xf32>
    %cst_35 = arith.constant dense<0.000000e+00> : vector<8xf32>
    %138 = vector.multi_reduction <add>, %137, %cst_35 [1] : vector<8x32xf32> to vector<8xf32>
    %139 = vector.shape_cast %138 : vector<8xf32> to vector<8x1xf32>
    %cst_36 = arith.constant 3.200000e+01 : f32
    %140 = vector.broadcast %cst_36 : f32 to vector<8x1xf32>
    %141 = arith.divf %139, %140 : vector<8x1xf32>
    %142 = vector.broadcast %141 : vector<8x1xf32> to vector<8x32xf32>
    %143 = arith.subf %137, %142 : vector<8x32xf32>
    %144 = arith.mulf %143, %143 : vector<8x32xf32>
    %cst_37 = arith.constant dense<0.000000e+00> : vector<8xf32>
    %145 = vector.multi_reduction <add>, %144, %cst_37 [1] : vector<8x32xf32> to vector<8xf32>
    %146 = vector.shape_cast %145 : vector<8xf32> to vector<8x1xf32>
    %cst_38 = arith.constant 3.200000e+01 : f32
    %147 = vector.broadcast %cst_38 : f32 to vector<8x1xf32>
    %148 = arith.divf %146, %147 : vector<8x1xf32>
    %149 = vector.broadcast %141 : vector<8x1xf32> to vector<8x32xf32>
    %150 = arith.subf %137, %149 : vector<8x32xf32>
    %cst_39 = arith.constant 9.99999974E-6 : f32
    %151 = vector.broadcast %cst_39 : f32 to vector<8x1xf32>
    %152 = arith.addf %148, %151 : vector<8x1xf32>
    %153 = math.rsqrt %152 : vector<8x1xf32>
    %154 = vector.broadcast %153 : vector<8x1xf32> to vector<8x32xf32>
    %155 = arith.mulf %150, %154 : vector<8x32xf32>
    %c0_40 = arith.constant 0 : index
    %c0_41 = arith.constant 0 : index
    %156 = vector.load %arg12[%c0_40, %c0_41] : memref<1x32xf32, #tpu.memory_space<vmem>>, vector<1x32xf32>
    %157 = vector.broadcast %156 : vector<1x32xf32> to vector<8x32xf32>
    %158 = arith.mulf %155, %157 : vector<8x32xf32>
    %c0_42 = arith.constant 0 : index
    %c0_43 = arith.constant 0 : index
    %159 = vector.load %arg13[%c0_42, %c0_43] : memref<1x32xf32, #tpu.memory_space<vmem>>, vector<1x32xf32>
    %160 = vector.broadcast %159 : vector<1x32xf32> to vector<8x32xf32>
    %161 = arith.addf %158, %160 : vector<8x32xf32>
    %162 = vector.shape_cast %161 : vector<8x32xf32> to vector<1x8x32xf32>
    %c0_44 = arith.constant 0 : index
    %c0_45 = arith.constant 0 : index
    %c0_46 = arith.constant 0 : index
    %163 = vector.load %arg14[%c0_44, %c0_45, %c0_46] : memref<1x8x32xf32, #tpu.memory_space<vmem>>, vector<1x8x32xf32>
    tpu.vector_store %arg14[%c0_44, %c0_45, %c0_46], %162 {strides = array<i32>} : memref<1x8x32xf32, #tpu.memory_space<vmem>>, vector<1x8x32xf32>,
    return
  }
  func.func @transform_0(%arg0: i32) -> (i32, i32, i32) {
    %c0_i32 = arith.constant 0 : i32
    %c0_i32_0 = arith.constant 0 : i32
    %c0_i32_1 = arith.constant 0 : i32
    return %arg0, %c0_i32, %c0_i32_0 : i32, i32, i32
  }
  func.func @transform_1(%arg0: i32) -> (i32, i32) {
    %c0_i32 = arith.constant 0 : i32
    %c0_i32_0 = arith.constant 0 : i32
    %c0_i32_1 = arith.constant 0 : i32
    return %c0_i32, %c0_i32_0 : i32, i32
  }
  func.func @transform_2(%arg0: i32) -> (i32, i32) {
    %c0_i32 = arith.constant 0 : i32
    %c0_i32_0 = arith.constant 0 : i32
    %c0_i32_1 = arith.constant 0 : i32
    return %c0_i32, %c0_i32_0 : i32, i32
  }
  func.func @transform_3(%arg0: i32) -> (i32, i32) {
    %c0_i32 = arith.constant 0 : i32
    %c0_i32_0 = arith.constant 0 : i32
    %c0_i32_1 = arith.constant 0 : i32
    return %c0_i32, %c0_i32_0 : i32, i32
  }
  func.func @transform_4(%arg0: i32) -> (i32, i32) {
    %c0_i32 = arith.constant 0 : i32
    %c0_i32_0 = arith.constant 0 : i32
    %c0_i32_1 = arith.constant 0 : i32
    return %c0_i32, %c0_i32_0 : i32, i32
  }
  func.func @transform_5(%arg0: i32) -> (i32, i32) {
    %c0_i32 = arith.constant 0 : i32
    %c0_i32_0 = arith.constant 0 : i32
    %c0_i32_1 = arith.constant 0 : i32
    return %c0_i32, %c0_i32_0 : i32, i32
  }
  func.func @transform_6(%arg0: i32) -> (i32, i32) {
    %c0_i32 = arith.constant 0 : i32
    %c0_i32_0 = arith.constant 0 : i32
    %c0_i32_1 = arith.constant 0 : i32
    return %c0_i32, %c0_i32_0 : i32, i32
  }
  func.func @transform_7(%arg0: i32) -> (i32, i32) {
    %c0_i32 = arith.constant 0 : i32
    %c0_i32_0 = arith.constant 0 : i32
    %c0_i32_1 = arith.constant 0 : i32
    return %c0_i32, %c0_i32_0 : i32, i32
  }
  func.func @transform_8(%arg0: i32) -> (i32, i32) {
    %c0_i32 = arith.constant 0 : i32
    %c0_i32_0 = arith.constant 0 : i32
    %c0_i32_1 = arith.constant 0 : i32
    return %c0_i32, %c0_i32_0 : i32, i32
  }
  func.func @transform_9(%arg0: i32) -> (i32, i32) {
    %c0_i32 = arith.constant 0 : i32
    %c0_i32_0 = arith.constant 0 : i32
    %c0_i32_1 = arith.constant 0 : i32
    return %c0_i32, %c0_i32_0 : i32, i32
  }
  func.func @transform_10(%arg0: i32) -> (i32, i32) {
    %c0_i32 = arith.constant 0 : i32
    %c0_i32_0 = arith.constant 0 : i32
    %c0_i32_1 = arith.constant 0 : i32
    return %c0_i32, %c0_i32_0 : i32, i32
  }
  func.func @transform_11(%arg0: i32) -> (i32, i32) {
    %c0_i32 = arith.constant 0 : i32
    %c0_i32_0 = arith.constant 0 : i32
    %c0_i32_1 = arith.constant 0 : i32
    return %c0_i32, %c0_i32_0 : i32, i32
  }
  func.func @transform_12(%arg0: i32) -> (i32, i32) {
    %c0_i32 = arith.constant 0 : i32
    %c0_i32_0 = arith.constant 0 : i32
    %c0_i32_1 = arith.constant 0 : i32
    return %c0_i32, %c0_i32_0 : i32, i32
  }
  func.func @transform_13(%arg0: i32) -> (i32, i32, i32) {
    %c0_i32 = arith.constant 0 : i32
    %c0_i32_0 = arith.constant 0 : i32
    %c0_i32_1 = arith.constant 0 : i32
    return %arg0, %c0_i32, %c0_i32_0 : i32, i32, i32
  }
}

</mosaic_0001>

<bundles_post_ra>
// kernel: tpu_custom_call.1
= control target key start
LH: loop header
LB: loop body
LE: loop exit
PB: predicated region body
PF: predicated region fallthrough
CT: control target
= control target key end

     0   :  { %s3072_s0 = inlined_call_operand.vmem [shape: f32[2,8,32], index: 0, kind: input, shape index: {}]   ;;  %s3073_s1 = inlined_call_operand.vmem [shape: bf16[32,96], index: 1, kind: input, shape index: {}]   ;;  %s3074_s2 = inlined_call_operand.hbm [shape: f32[1,96], index: 2, kind: input, shape index: {}]   ;;  %s3075_s3 = inlined_call_operand.vmem [shape: bf16[32,32], index: 3, kind: input, shape index: {}]   ;;  %s3076_s4 = inlined_call_operand.hbm [shape: f32[1,32], index: 4, kind: input, shape index: {}]   ;;  %s3077_s5 = inlined_call_operand.hbm [shape: f32[1,32], index: 5, kind: input, shape index: {}]   ;;  %s3078_s6 = inlined_call_operand.hbm [shape: f32[1,32], index: 6, kind: input, shape index: {}]   ;;  %s3079_s7 = inlined_call_operand.hbm [shape: bf16[32,64], index: 7, kind: input, shape index: {}]   ;;  %s3080_s8 = inlined_call_operand.hbm [shape: f32[1,64], index: 8, kind: input, shape index: {}]   ;;  %s3081_s9 = inlined_call_operand.vmem [shape: bf16[64,32], index: 9, kind: input, shape index: {}]   ;;  %s3082_s10 = inlined_call_operand.vmem [shape: f32[1,32], index: 10, kind: input, shape index: {}]   ;;  %s3083_s11 = inlined_call_operand.vmem [shape: f32[1,32], index: 11, kind: input, shape index: {}]   ;;  %s3084_s12 = inlined_call_operand.vmem [shape: f32[1,32], index: 12, kind: input, shape index: {}]   ;;  %s3085_s13 = inlined_call_operand.hbm [shape: f32[2,8,32], index: 13, kind: output, shape index: {}]  }
   0x1   :  { %3093 = sst [smem:[#allocation23_spill]] %s3074_s2 }
   0x2   :  { %3094 = sst [smem:[#allocation24_spill]] %s3076_s4 }
   0x3   :  { %18 = vsyncpa [#allocation3], 0 }
   0x4   :  { %19 = vsyncpa [#allocation6], 0 }
   0x5   :  { %20 = vsyncpa [#allocation9], 0 }
   0x6   :  { %21 = vsyncpa [#allocation12], 0 }
   0x7   :  { %22 = vsyncpa [#allocation4], 0 }
   0x8   :  { %24 = vsyncpa [#allocation4 + $0x1], 0  ;;  %s2678_s25 = smov 0   ;;  %s2680_s26 = smov 0  }
   0x9   :  { %s2682_s27 = smov 0   ;;  %s2684_s28 = smov 0  }
   0xa LB: > { %3095 = sst [smem:[#allocation19_spill]] %s2575_s27  ;;  %s2699_s29 = sadd.s32 4294967295, %s2579_s28   ;;  %s2579_s28 = sphi %s2684_s28, %s3118_s28   ;;  %s2575_s27 = sphi %s2682_s27, %s3120_s27   ;;  %s2571_s26 = sphi %s2680_s26, %s3122_s26   ;;  %s2567_s25 = sphi %s2678_s25, %s3121_s25  }
   0xb   : > { %s1943_s30 = sadd.s32 4294967294, %s2579_s28   ;;  %s2703_s14 = sadd.s32 1, %s2579_s28  }
   0xc   : > { %3096 = sst [smem:[#allocation20_spill]] %s2703_s14  ;;  %s315_s15 = sadd.s32 1, %s2575_s27 }
   0xd   : > { %s312_s16 = ssub.s32 %s2579_s28, %s2703_s14  ;;  %p325_p0 = scmp.ne.s32.totalorder %s2575_s27, %s2571_s26 }
   0xe   : > { %p313_p1 = scmp.eq.s32.totalorder %s312_s16, 0  ;;  %p326_p2 = scmp.eq.s32.totalorder %s2699_s29, 1 }
   0xf   : > { %p331_p3 = scmp.ne.s32.totalorder %s2571_s26, %s2567_s25  ;;  %p332_p4 = scmp.eq.s32.totalorder %s1943_s30, 1 }
  0x10   : > { %s2714_s17 = scalar_select %p313_p1, %s2575_s27, %s315_s15  }
  0x11   : > { %p2716_p5 = por %p326_p2, %p325_p0  ;;  %p2720_p6 = por %p332_p4, %p331_p3 }
  0x12   : > { %3097 = sst [smem:[#allocation21_spill]] %s2714_s17  ;;  %p1944_p7 = scmp.ge.s32.totalorder %s2579_s28, 1 }
  0x13   : > { %s3098_s18 = scalar_select %p2716_p5, 1, 0 }
  0x14   : > { %s3099_s19 = scalar_select %p2720_p6, 1, 0 }
  0x15   : > { %p339_p8 = scmp.lt.s32.totalorder %s2579_s28, 3  ;;  %p3089_p9 = scmp.eq.s32.totalorder %s2699_s29, 0 }
  0x16   : > { %3100 = sst [smem:[#allocation22_spill]] %s3099_s19  ;;  %s2581_s21 = smov [#allocation5]  }
  0x17   : > { %p2727_p10 = pnand %p1944_p7, %p339_p8  ;;  %s369_s22 = sshll.u32 %s2581_s21, 4  ;;  %s370_s22 = int_to_ptr.vmem [resolvable:$true] %s369_s22 }
  0x18   : > { %s2582_s23 = smov [#allocation8]   ;;  %s2583_s15 = smov [#allocation2]  }
  0x19   : > { %s3101_s20 = scalar_select %p2727_p10, 1, 0 }
  0x1a   : > { %p2207_p11 = pneg %p2727_p10  ;;  %s391_s24 = sshll.u32 %s2582_s23, 4  ;;  %s392_s24 = int_to_ptr.vmem [resolvable:$true] %s391_s24 }
  0x1b   : > { %s355_s16 = sshll.u32 %s2583_s15, 4  ;;  %s2358_s21 = scalar_lea.vmem %s370_s22, 16  ;;  %s2739_s16 = int_to_ptr.vmem [resolvable:$true] %s355_s16 }
  0x1c   : > { %p2735_p12 = pnand %p3089_p9, %p2207_p11  ;;  %p2359_p0 = scmp.ne.s32.totalorder %s370_s22, %s2358_s21 }
  0x1d   : > { %s2365_s23 = scalar_lea.vmem %s370_s22, 32  ;;  %p2366_p3 = scmp.lt.s32.totalorder %s370_s22, %s370_s22 }
  0x1e   : > { %p2743_p13 = pneg %p2735_p12  ;;  %p2367_p4 = scmp.lt.s32.totalorder %s2365_s23, %s2358_s21 }
  0x20   : > { %p2361_p1 = pnand %p2359_p0, %p2743_p13  ;;  %p2368_p7 = por %p2367_p4, %p2366_p3 }
  0x22   : > { %p2362_p2 = pneg %p2361_p1 }
  0x24   : > { %p2369_p8 = pnand %p2368_p7, %p2362_p2 }
  0x26   : > { %2372 = shalt.err (!%p2369_p8)
}
  0x27   : > { %s3104_s4 = sld [smem:[#allocation24_spill]]  ;;  %s2384_s14 = scalar_lea.vmem %s392_s24, 16 }
  0x28   : > { %p2385_p11 = scmp.ne.s32.totalorder %s392_s24, %s2384_s14  ;;  %s2391_s19 = scalar_lea.vmem %s392_s24, 32 }
  0x29   : > { %p2392_p0 = scmp.lt.s32.totalorder %s392_s24, %s392_s24  ;;  %p2393_p1 = scmp.lt.s32.totalorder %s2391_s19, %s2384_s14 }
  0x2a   : > { %p2387_p9 = pnand %p2385_p11, %p2743_p13 }
  0x2b   : > { %p2394_p5 = por %p2393_p1, %p2392_p0 }
  0x2c   : > { %p2388_p6 = pneg %p2387_p9 }
  0x2d   : > { %2213 = dma.hbm_to_vmem [thread:$0]  (!%p2735_p12), %s3104_s4, 16, %s370_s22, [#allocation6]  }
  0x2e   : > { %p2395_p10 = pnand %p2394_p5, %p2388_p6 }
  0x30   : > { %2398 = shalt.err (!%p2395_p10)
}
  0x31   : > { %2219 = dma.hbm_to_vmem [thread:$0]  (!%p2735_p12), %s3078_s6, 16, %s392_s24, [#allocation9]  }
  0x32   : > { %s2410_s27 = scalar_lea.vmem %s2739_s16, 16  ;;  %s2417_s14 = scalar_lea.vmem %s2739_s16, 32 }
  0x33   : > { %p2411_p2 = scmp.ne.s32.totalorder %s2739_s16, %s2410_s27  ;;  %p2418_p5 = scmp.lt.s32.totalorder %s2739_s16, %s2739_s16 }
  0x34   : > { %p2419_p6 = scmp.lt.s32.totalorder %s2417_s14, %s2410_s27 }
  0x35   : > { %p2413_p9 = pnand %p2411_p2, %p2743_p13 }
  0x36   : > { %p2420_p10 = por %p2419_p6, %p2418_p5 }
  0x37   : > { %p2414_p3 = pneg %p2413_p9 }
  0x39   : > { %p2421_p4 = pnand %p2420_p10, %p2414_p3 }
  0x3b   : > { %2424 = shalt.err (!%p2421_p4)
}
  0x3c   : > { %s3105_s2 = sld [smem:[#allocation23_spill]]  ;;  %s2584_s24 = smov [#allocation7]  }
  0x3d   : > { %s380_s15 = sshll.u32 %s2584_s24, 4  ;;  %s2585_s21 = smov [#allocation10]   ;;  %s381_s15 = int_to_ptr.vmem [resolvable:$true] %s380_s15 }
  0x3e   : > { %s401_s23 = sshll.u32 %s2585_s21, 4  ;;  %s2436_s4 = scalar_lea.vmem %s381_s15, 16  ;;  %s402_s23 = int_to_ptr.vmem [resolvable:$true] %s401_s23 }
  0x3f   : > { %p2437_p7 = scmp.ne.s32.totalorder %s381_s15, %s2436_s4  ;;  %s2443_s27 = scalar_lea.vmem %s381_s15, 32 }
  0x40   : > { %p2444_p0 = scmp.lt.s32.totalorder %s381_s15, %s381_s15  ;;  %p2445_p1 = scmp.lt.s32.totalorder %s2443_s27, %s2436_s4 }
  0x41   : > { %p2439_p8 = pnand %p2437_p7, %p2743_p13 }
  0x42   : > { %2210 = dma.hbm_to_vmem [thread:$0]  (!%p2735_p12), %s3105_s2, 16, %s2739_s16, [#allocation3]  }
  0x43   : > { %p2440_p11 = pneg %p2439_p8  ;;  %p2446_p2 = por %p2445_p1, %p2444_p0 }
  0x45   : > { %p2447_p9 = pnand %p2446_p2, %p2440_p11 }
  0x47   : > { %2450 = shalt.err (!%p2447_p9)
}
  0x48   : > { %2216 = dma.hbm_to_vmem [thread:$0]  (!%p2735_p12), %s3077_s5, 16, %s381_s15, [#allocation6]  }
  0x49   : > { %s2462_s19 = scalar_lea.vmem %s402_s23, 256  ;;  %p2470_p10 = scmp.lt.s32.totalorder %s402_s23, %s402_s23 }
  0x4a   : > { %p2463_p3 = scmp.ne.s32.totalorder %s402_s23, %s2462_s19  ;;  %p2471_p4 = scmp.lt.s32.totalorder %s2462_s19, %s2462_s19 }
  0x4c   : > { %p2465_p5 = pnand %p2463_p3, %p2743_p13  ;;  %p2472_p7 = por %p2471_p4, %p2470_p10 }
  0x4e   : > { %p2466_p6 = pneg %p2465_p5 }
  0x50   : > { %p2473_p8 = pnand %p2472_p7, %p2466_p6 }
  0x52   : > { %2476 = shalt.err (!%p2473_p8)
}
  0x53   : > { %s2586_s4 = smov 64   ;;  %s2587_s22 = smov 4  }
  0x54   : > { %2222 = dma.hbm_to_vmem [thread:$0]  (!%p2735_p12), %s3079_s7, 256, %s402_s23, [#allocation9], %s2586_s4, %s2586_s4, %s2587_s22  }
  0x55   : > { %s2588_s15 = smov [#allocation11]  }
  0x56   : > { %s415_s27 = sshll.u32 %s2588_s15, 4  ;;  %s416_s27 = int_to_ptr.vmem [resolvable:$true] %s415_s27 }
  0x57   : > { %s2488_s14 = scalar_lea.vmem %s416_s27, 16  ;;  %s2495_s16 = scalar_lea.vmem %s416_s27, 32 }
  0x58   : > { %p2489_p11 = scmp.ne.s32.totalorder %s416_s27, %s2488_s14  ;;  %p2496_p2 = scmp.lt.s32.totalorder %s416_s27, %s416_s27 }
  0x59   : > { %p2497_p9 = scmp.lt.s32.totalorder %s2495_s16, %s2488_s14 }
  0x5a   : > { %p2491_p0 = pnand %p2489_p11, %p2743_p13 }
  0x5b   : > { %p2498_p3 = por %p2497_p9, %p2496_p2 }
  0x5c   : > { %p2492_p1 = pneg %p2491_p0 }
  0x5e   : > { %p2499_p5 = pnand %p2498_p3, %p2492_p1 }
  0x60   : > { %2502 = shalt.err (!%p2499_p5)
}
  0x61   : > { %2225 = dma.hbm_to_vmem [thread:$0]  (!%p2735_p12), %s3080_s8, 16, %s416_s27, [#allocation12]  }
  0x62   : > { %p3106_p6 = scmp.ne.s32.totalorder %s3101_s20, 0 }
  0x63   : > { %p3107_p10 = scmp.eq.s32.totalorder (!%p3106_p6), %s2699_s29, 0 }
  0x64   : > { %447 = sbr.rel (%p3106_p6) target bundleno = 2671 (0xa6f), region = 72 }
  0x69   : > { %2546 = dma.done.wait (%p3107_p10), [#allocation3], 16   ;;  %p3108_p13 = pmov %p3107_p10 }
  0x6a   : > { %p3109_p4 = pmov %p3107_p10 }
  0x6b   : > { %2548 = vsyncadd (%p3108_p13), [#allocation3], 4294967280 }
  0x6c   : > { %2550 = dma.done.wait (%p3109_p4), [#allocation6], 32   ;;  %p3110_p7 = pmov %p3109_p4 }
  0x6d   : > { %p3111_p8 = pmov %p3109_p4 }
  0x6e   : > { %2552 = vsyncadd (%p3110_p7), [#allocation6], 4294967264 }
  0x6f   : > { %2554 = dma.done.wait (%p3111_p8), [#allocation9], 272   ;;  %p3112_p12 = pmov %p3109_p4 }
  0x70   : > { %p3113_p11 = pmov %p3109_p4 }
  0x71   : > { %2556 = vsyncadd (%p3112_p12), [#allocation9], 4294967024 }
  0x72   : > { %2558 = dma.done.wait (%p3113_p11), [#allocation12], 16   ;;  %p3114_p0 = pmov %p3109_p4 }
  0x73   : > { %p510_p1 = scmp.lt.s32.totalorder %s2699_s29, 1  ;;  %v2589_v0 = vmov 0.0   ;;  %vm2590_vm0 = vmmov 0   ;;  %v2301_v1 = vld [vmem:[%s3073_s1 + $0x8] sm:$0xff]   ;;  %v2302_v2 = vld [vmem:[%s3073_s1] sm:$0xff]   ;;  %vm540_vm1 = vcmask 261120  }
  0x74   : > { %2560 = vsyncadd (%p3114_p0), [#allocation12], 4294967280  ;;  %2049 = vmatprep.subr.bf16.mxu0 %v2589_v0  ;;  %2053 = vmatprep.mubr.msk.bf16.mxu0 %vm2590_vm0, %v2589_v0  ;;  %v1961_v5 = vld [vmem:[#allocation2] ss:$0 sm:$0xff]  ;;  %s2591_s15 = smov 116   ;;  %s2592_s27 = smov 124  }
  0x75   : > { %s511_s2 = scalar_select %p510_p1, %s2699_s29, 1  ;;  %2057 = vmatprep.subr.bf16.mxu1 %v2589_v0  ;;  %2059 = vmatprep.mubr.msk.bf16.mxu1 %vm2590_vm0, %v2589_v0  ;;  %vm617_vm2 = vcmask 31744   ;;  %vm1109_vm3 = vcmask 1043456   ;;  %vm1007_vm4 = vcmask 64512   ;;  %vm1519_vm5 = vcmask 97280  }
  0x76   : > { %2050 = vmatpush3.bf16.msra.mxu0 %v2301_v1  ;;  %s2593_s14 = smov 112   ;;  %s2594_s16 = smov 120   ;;  %vm1521_vm6 = vcmask 130048   ;;  %vm1523_vm7 = vcmask 162816   ;;  %vm1525_vm8 = vcmask 195584   ;;  %vm1527_vm9 = vcmask 228352  }
  0x77   : > { %s1960_s17 = sshll.u32 %s511_s2, 3  ;;  %2051 = vmatprep.subr.bf16.mxu0 %v2589_v0  ;;  %s2595_s19 = smov 104   ;;  %vm1735_vm10 = vcmask 523264  }
  0x78   : > { %s513_s23 = scalar_lea.vmem %s3072_s0, %s1960_s17  ;;  %s2596_s2 = smov 108  }
  0x79   : > { %v2830_v3 = vld [vmem:[%s513_s23] sm:$0xff]  ;;  %s2597_s17 = smov 100   ;;  %s2598_s20 = smov 96  }
  0x7a   : > { %v516_v4 = vpack.c.bf16 %v2830_v3, %v2830_v3  ;;  %2052 = vmatpush3.bf16.msra.mxu0 %v2302_v2  ;;  %s2599_s30 = smov 64   ;;  %s2600_s23 = smov 4  }
  0x7b   : > { %2063 = vmatprep.subr.bf16.mxu0 %v2589_v0  ;;  %s2601_s4 = smov 8   ;;  %s2602_s21 = smov 12  }
  0x7c   : > { %p3115_p9 = scmp.ne.s32.totalorder %s3098_s18, 0 }
  0x7d   : > { %2054 = vmatmul.mubr.msk.bf16.vlgmr.msra.gmra.mxu0 %vm540_vm1, %v516_v4 }
  0x7e   : > { %2065 = vmatprep.mubr.msk.bf16.mxu0 %vm2590_vm0, %v2589_v0 }
 0x13d   : > { %v578_v6 = vpop.f32.mrf.mxu0 }
 0x13e   : > { %v579_v7 = vadd.f32 %v1961_v5, %v578_v6 }
 0x13f   : > { %v2055_v8 = vpop.f32.mrf.mxu0 }
 0x140   : > { %591 = vrot.lane.b32.xlu1 %v579_v7, %s2591_s15  ;;  %585 = vrot.lane.b32.xlu0 %v579_v7, %s2592_s27  ;;  %v606_v11 = vpack.c.bf16 %v579_v7, %v579_v7 }
 0x141   : > { %v581_v9 = vpop.f32.mrf.mxu0 }
 0x143   : > { %v2056_v10 = vpop.f32.mrf.mxu0 }
 0x144   : > { %594 = vrot.lane.b32.xlu1 %v579_v7, %s2593_s14  ;;  %588 = vrot.lane.b32.xlu0 %v579_v7, %s2594_s16  ;;  %s2603_s14 = smov 16   ;;  %s2604_s16 = smov 20  }
 0x148   : > { %600 = vrot.lane.b32.xlu1 %v579_v7, %s2595_s19  ;;  %597 = vrot.lane.b32.xlu0 %v579_v7, %s2596_s2  ;;  %s2605_s19 = smov 24   ;;  %s2606_s2 = smov 28  }
 0x14c   : > { %603 = vrot.lane.b32.xlu0 %v579_v7, %s2597_s17  ;;  %615 = vrot.lane.b32.xlu1 %v606_v11, %s2598_s20 }
 0x1b2   : > { %v592_v12 = vpop.permute.xlu1 %591  ;;  %v586_v13 = vpop.permute.xlu0 %585 }
 0x1b3   : > { %v607_v14 = vpack.c.bf16 %v586_v13, %v586_v13  ;;  %v2839_v17 = vpack.c.bf16 %v592_v12, %v592_v12 }
 0x1b5   : > { %665 = vrot.lane.b32.xlu0 %v607_v14, %s2598_s20 }
 0x1b6   : > { %v595_v15 = vpop.permute.xlu1 %594  ;;  %v589_v16 = vpop.permute.xlu0 %588 }
 0x1b7   : > { %v2841_v18 = vpack.c.bf16 %v589_v16, %v589_v16  ;;  %v2845_v21 = vpack.c.bf16 %v595_v15, %v595_v15 }
 0x1b9   : > { %763 = vrot.lane.b32.xlu0 %v2839_v17, %s2598_s20  ;;  %714 = vrot.lane.b32.xlu1 %v2841_v18, %s2598_s20 }
 0x1ba   : > { %v601_v19 = vpop.permute.xlu1 %600  ;;  %v598_v20 = vpop.permute.xlu0 %597 }
 0x1bb   : > { %v2847_v22 = vpack.c.bf16 %v598_v20, %v598_v20  ;;  %v2851_v25 = vpack.c.bf16 %v601_v19, %v601_v19 }
 0x1bd   : > { %861 = vrot.lane.b32.xlu0 %v2847_v22, %s2598_s20  ;;  %812 = vrot.lane.b32.xlu1 %v2845_v21, %s2598_s20 }
 0x1be   : > { %v604_v23 = vpop.permute.xlu0 %603  ;;  %v616_v24 = vpop.permute.xlu1 %615 }
 0x1bf   : > { %v2853_v26 = vpack.c.bf16 %v604_v23, %v604_v23  ;;  %v622_v27 = vsel %vm617_vm2, %v616_v24, 0 }
 0x1c0   : > { %2058 = vmatpush3.bf16.xpose.msra.mxu1 %v622_v27 }
 0x1c1   : > { %959 = vrot.lane.b32.xlu0 %v2853_v26, %s2598_s20  ;;  %910 = vrot.lane.b32.xlu1 %v2851_v25, %s2598_s20 }
 0x1c2   : > { %2069 = vmatprep.subr.bf16.mxu1 %v2589_v0 }
 0x1c5   : > { %1104 = vrot.lane.b32.xlu0 %v606_v11, %s2599_s30  ;;  %1153 = vrot.lane.b32.xlu1 %v607_v14, %s2599_s30 }
 0x1c7   : > { %2060 = vmatmul.mubr.msk.bf16.vlgmr.msra.gmra.mxu1 %vm617_vm2, %v606_v11 }
 0x1c8   : > { %2071 = vmatprep.mubr.msk.bf16.mxu1 %vm2590_vm0, %v2589_v0 }
 0x227   : > { %v666_v28 = vpop.permute.xlu0 %665 }
 0x228   : > { %v671_v29 = vsel %vm617_vm2, %v666_v28, 0 }
 0x229   : > { %2064 = vmatpush3.bf16.xpose.msra.mxu0 %v671_v29 }
 0x22a   : > { %2075 = vmatprep.subr.bf16.mxu0 %v2589_v0 }
 0x22b   : > { %v715_v30 = vpop.permute.xlu1 %714  ;;  %v764_v32 = vpop.permute.xlu0 %763 }
 0x22c   : > { %v720_v31 = vsel %vm617_vm2, %v715_v30, 0  ;;  %v769_v33 = vsel %vm617_vm2, %v764_v32, 0 }
 0x22d   : > { %2070 = vmatpush3.bf16.xpose.msra.mxu1 %v720_v31 }
 0x22e   : > { %2081 = vmatprep.subr.bf16.mxu1 %v2589_v0 }
 0x22f   : > { %v813_v34 = vpop.permute.xlu1 %812  ;;  %v862_v36 = vpop.permute.xlu0 %861 }
 0x230   : > { %2066 = vmatmul.mubr.msk.bf16.vlgmr.msra.gmra.mxu0 %vm617_vm2, %v607_v14  ;;  %v818_v35 = vsel %vm617_vm2, %v813_v34, 0  ;;  %v867_v37 = vsel %vm617_vm2, %v862_v36, 0 }
 0x231   : > { %2076 = vmatpush3.bf16.xpose.msra.mxu0 %v769_v33  ;;  %2077 = vmatprep.mubr.msk.bf16.mxu0 %vm2590_vm0, %v2589_v0 }
 0x232   : > { %2087 = vmatprep.subr.bf16.mxu0 %v2589_v0 }
 0x233   : > { %v911_v38 = vpop.permute.xlu1 %910  ;;  %v960_v39 = vpop.permute.xlu0 %959 }
 0x234   : > { %2072 = vmatmul.mubr.msk.bf16.vlgmr.msra.gmra.mxu1 %vm617_vm2, %v2841_v18  ;;  %v916_v40 = vsel %vm617_vm2, %v911_v38, 0  ;;  %v965_v41 = vsel %vm617_vm2, %v960_v39, 0 }
 0x235   : > { %2082 = vmatpush3.bf16.xpose.msra.mxu1 %v818_v35  ;;  %2083 = vmatprep.mubr.msk.bf16.mxu1 %vm2590_vm0, %v2589_v0 }
 0x236   : > { %2093 = vmatprep.subr.bf16.mxu1 %v2589_v0 }
 0x237   : > { %v1105_v42 = vpop.permute.xlu0 %1104  ;;  %v1154_v44 = vpop.permute.xlu1 %1153 }
 0x238   : > { %2078 = vmatmul.mubr.msk.bf16.vlgmr.msra.gmra.mxu0 %vm617_vm2, %v2839_v17  ;;  %v1111_v43 = vsel %vm1109_vm3, %v1105_v42, 0  ;;  %v1159_v45 = vsel %vm1109_vm3, %v1154_v44, 0 }
 0x239   : > { %2088 = vmatpush3.bf16.xpose.msra.mxu0 %v867_v37  ;;  %2089 = vmatprep.mubr.msk.bf16.mxu0 %vm2590_vm0, %v2589_v0 }
 0x23a   : > { %2099 = vmatprep.subr.bf16.mxu0 %v2589_v0 }
 0x23c   : > { %2084 = vmatmul.mubr.msk.bf16.vlgmr.msra.gmra.mxu1 %vm617_vm2, %v2845_v21 }
 0x23d   : > { %2094 = vmatpush3.bf16.xpose.msra.mxu1 %v916_v40  ;;  %2095 = vmatprep.mubr.msk.bf16.mxu1 %vm2590_vm0, %v2589_v0 }
 0x23e   : > { %2105 = vmatprep.subr.bf16.mxu1 %v2589_v0 }
 0x240   : > { %2090 = vmatmul.mubr.msk.bf16.vlgmr.msra.gmra.mxu0 %vm617_vm2, %v2847_v22 }
 0x241   : > { %2100 = vmatpush3.bf16.xpose.msra.mxu0 %v965_v41  ;;  %2101 = vmatprep.mubr.msk.bf16.mxu0 %vm2590_vm0, %v2589_v0 }
 0x242   : > { %2111 = vmatprep.subr.bf16.mxu0 %v2589_v0 }
 0x244   : > { %2096 = vmatmul.mubr.msk.bf16.vlgmr.msra.gmra.mxu1 %vm617_vm2, %v2851_v25 }
 0x245   : > { %2106 = vmatpush3.bf16.msra.mxu1 %v1111_v43  ;;  %2107 = vmatprep.mubr.msk.bf16.mxu1 %vm2590_vm0, %v2589_v0 }
 0x246   : > { %2117 = vmatprep.subr.bf16.mxu1 %v2589_v0 }
 0x248   : > { %2102 = vmatmul.mubr.msk.bf16.vlgmr.msra.gmra.mxu0 %vm617_vm2, %v2853_v26 }
 0x249   : > { %2112 = vmatpush3.bf16.msra.mxu0 %v1159_v45  ;;  %2113 = vmatprep.mubr.msk.bf16.mxu0 %vm2590_vm0, %v2589_v0 }
 0x24a   : > { %2123 = vmatprep.subr.bf16.mxu0 %v2589_v0 }
 0x287   : > { %v658_v46 = vpop.f32.mrf.mxu1 }
 0x288   : > { %v1008_v47 = vsel %vm1007_vm4, %v658_v46, -inf }
 0x289   : > { %1009 = vmax.xlane.f32.xlu1 %v1008_v47  ;;  %v2061_v48 = vpop.f32.mrf.mxu1 }
 0x28b   : > { %v661_v49 = vpop.f32.mrf.mxu1 }
 0x28d   : > { %v2062_v50 = vpop.f32.mrf.mxu1 }
 0x2f0   : > { %v707_v51 = vpop.f32.mrf.mxu0 }
 0x2f1   : > { %v1011_v52 = vsel %vm1007_vm4, %v707_v51, -inf }
 0x2f2   : > { %1012 = vmax.xlane.f32.xlu0 %v1011_v52  ;;  %v2067_v53 = vpop.f32.mrf.mxu0 }
 0x2f4   : > { %v710_v54 = vpop.f32.mrf.mxu0  ;;  %v756_v55 = vpop.f32.mrf.mxu1 }
 0x2f5   : > { %v1014_v56 = vsel %vm1007_vm4, %v756_v55, -inf }
 0x2f6   : > { %v2073_v57 = vpop.f32.mrf.mxu1  ;;  %1015 = vmax.xlane.f32.xlu0 %v1014_v56  ;;  %v2068_v58 = vpop.f32.mrf.mxu0 }
 0x2f8   : > { %v759_v59 = vpop.f32.mrf.mxu1  ;;  %v805_v60 = vpop.f32.mrf.mxu0 }
 0x2f9   : > { %v1017_v61 = vsel %vm1007_vm4, %v805_v60, -inf }
 0x2fa   : > { %v2074_v62 = vpop.f32.mrf.mxu1  ;;  %1018 = vmax.xlane.f32.xlu1 %v1017_v61  ;;  %v2079_v63 = vpop.f32.mrf.mxu0 }
 0x2fc   : > { %v808_v1 = vpop.f32.mrf.mxu0  ;;  %v854_v2 = vpop.f32.mrf.mxu1 }
 0x2fd   : > { %v1020_v4 = vsel %vm1007_vm4, %v854_v2, -inf }
 0x2fe   : > { %v2085_v5 = vpop.f32.mrf.mxu1  ;;  %1021 = vmax.xlane.f32.xlu0 %v1020_v4  ;;  %v2080_v6 = vpop.f32.mrf.mxu0 }
 0x300   : > { %v857_v7 = vpop.f32.mrf.mxu1  ;;  %v903_v8 = vpop.f32.mrf.mxu0 }
 0x301   : > { %v1023_v9 = vsel %vm1007_vm4, %v903_v8, -inf }
 0x302   : > { %v2086_v10 = vpop.f32.mrf.mxu1  ;;  %1024 = vmax.xlane.f32.xlu1 %v1023_v9  ;;  %v2091_v11 = vpop.f32.mrf.mxu0 }
 0x304   : > { %v906_v12 = vpop.f32.mrf.mxu0  ;;  %v952_v13 = vpop.f32.mrf.mxu1 }
 0x305   : > { %v1026_v14 = vsel %vm1007_vm4, %v952_v13, -inf }
 0x306   : > { %v2097_v15 = vpop.f32.mrf.mxu1  ;;  %1027 = vmax.xlane.f32.xlu0 %v1026_v14  ;;  %v2092_v16 = vpop.f32.mrf.mxu0 }
 0x308   : > { %v955_v19 = vpop.f32.mrf.mxu1  ;;  %v1001_v20 = vpop.f32.mrf.mxu0 }
 0x309   : > { %v1029_v23 = vsel %vm1007_vm4, %v1001_v20, -inf }
 0x30a   : > { %v2098_v24 = vpop.f32.mrf.mxu1  ;;  %1030 = vmax.xlane.f32.xlu1 %v1029_v23  ;;  %v2103_v27 = vpop.f32.mrf.mxu0 }
 0x30c   : > { %v1004_v28 = vpop.f32.mrf.mxu0 }
 0x30e   : > { %v2104_v29 = vpop.f32.mrf.mxu0 }
 0x312   : > { %v1010_v30 = vpop.xlane.xlu1 %1009 }
 0x313   : > { %v1032_v31 = vsub.f32 %v658_v46, %v1010_v30 }
 0x315   : > { %v1040_v32 = vmul.f32 1.442695, %v1032_v31 }
 0x317   : > { %2311 = vpow2.f32 %v1040_v32 }
 0x31b   : > { %1201 = vrot.lane.b32.xlu1 %v2841_v18, %s2599_s30 }
 0x31c   : > { %1249 = vrot.lane.b32.xlu0 %v2839_v17, %s2599_s30 }
 0x324   : > { %v2312_v33 = vpop.eup %2311 }
 0x325   : > { %v1056_v34 = vsel %vm1007_vm4, %v2312_v33, 0.0 }
 0x33b   : > { %1057 = vadd.xlane.f32.xlu0 %v1056_v34 }
 0x37b   : > { %v1013_v35 = vpop.xlane.xlu0 %1012 }
 0x37c   : > { %v1033_v36 = vsub.f32 %v707_v51, %v1013_v35 }
 0x37e   : > { %v1042_v37 = vmul.f32 1.442695, %v1033_v36 }
 0x37f   : > { %v1016_v38 = vpop.xlane.xlu0 %1015 }
 0x380   : > { %2313 = vpow2.f32 %v1042_v37  ;;  %v1034_v39 = vsub.f32 %v756_v55, %v1016_v38 }
 0x382   : > { %v1044_v40 = vmul.f32 1.442695, %v1034_v39 }
 0x383   : > { %v1019_v43 = vpop.xlane.xlu1 %1018 }
 0x384   : > { %2315 = vpow2.f32 %v1044_v40  ;;  %v1035_v44 = vsub.f32 %v805_v60, %v1019_v43 }
 0x386   : > { %v1046_v48 = vmul.f32 1.442695, %v1035_v44 }
 0x387   : > { %v1022_v45 = vpop.xlane.xlu0 %1021 }
 0x388   : > { %v1036_v47 = vsub.f32 %v854_v2, %v1022_v45  ;;  %2317 = vpow2.f32 %v1046_v48 }
 0x38a   : > { %v1048_v52 = vmul.f32 1.442695, %v1036_v47 }
 0x38b   : > { %v1025_v46 = vpop.xlane.xlu1 %1024 }
 0x38c   : > { %v1037_v49 = vsub.f32 %v903_v8, %v1025_v46  ;;  %2319 = vpow2.f32 %v1048_v52 }
 0x38d   : > { %v2314_v18 = vpop.eup %2313 }
 0x38e   : > { %v1059_v41 = vsel %vm1007_vm4, %v2314_v18, 0.0  ;;  %v1050_v54 = vmul.f32 1.442695, %v1037_v49 }
 0x38f   : > { %1060 = vadd.xlane.f32.xlu1 %v1059_v41  ;;  %v1028_v50 = vpop.xlane.xlu0 %1027 }
 0x390   : > { %v1038_v53 = vsub.f32 %v952_v13, %v1028_v50  ;;  %2321 = vpow2.f32 %v1050_v54 }
 0x391   : > { %v2923_v17 = vpop.eup %2315 }
 0x392   : > { %v1062_v42 = vsel %vm1007_vm4, %v2923_v17, 0.0  ;;  %v1052_v56 = vmul.f32 1.442695, %v1038_v53 }
 0x393   : > { %1063 = vadd.xlane.f32.xlu0 %v1062_v42  ;;  %v1031_v51 = vpop.xlane.xlu1 %1030  ;;  %v1250_v57 = vpop.permute.xlu0 %1249 }
 0x394   : > { %v1039_v55 = vsub.f32 %v1001_v20, %v1031_v51  ;;  %2323 = vpow2.f32 %v1052_v56  ;;  %v1255_v19 = vsel %vm1109_vm3, %v1250_v57, 0 }
 0x397   : > { %v1202_v8 = vpop.permute.xlu1 %1201 }
 0x398   : > { %v1207_v10 = vsel %vm1109_vm3, %v1202_v8, 0 }
 0x3a0   : > { %1297 = vrot.lane.b32.xlu1 %v2845_v21, %s2599_s30  ;;  %v1054_v21 = vmul.f32 1.442695, %v1039_v55 }
 0x3a2   : > { %2325 = vpow2.f32 %v1054_v21 }
 0x3a9   : > { %1345 = vrot.lane.b32.xlu0 %v2847_v22, %s2599_s30  ;;  %v2318_v22 = vpop.eup %2317 }
 0x3aa   : > { %v2931_v58 = vpop.eup %2319  ;;  %v1065_v59 = vsel %vm1007_vm4, %v2318_v22, 0.0 }
 0x3ab   : > { %v2934_v60 = vpop.eup %2321  ;;  %v1068_v63 = vsel %vm1007_vm4, %v2931_v58, 0.0 }
 0x3ac   : > { %v2936_v62 = vpop.eup %2323  ;;  %v1071_v1 = vsel %vm1007_vm4, %v2934_v60, 0.0 }
 0x3ad   : > { %v1074_v4 = vsel %vm1007_vm4, %v2936_v62, 0.0 }
 0x3af   : > { %v2942_v2 = vpop.eup %2325 }
 0x3b0   : > { %v1077_v5 = vsel %vm1007_vm4, %v2942_v2, 0.0 }
 0x3c4   : > { %v1058_v61 = vpop.xlane.xlu0 %1057  ;;  %1066 = vadd.xlane.f32.xlu1 %v1065_v59 }
 0x3c5   : > { %2327 = vrcp.f32 %v1058_v61 }
 0x3c8   : > { %1069 = vadd.xlane.f32.xlu0 %v1068_v63  ;;  %1072 = vadd.xlane.f32.xlu1 %v1071_v1  ;;  %v2304_v63 = vld [vmem:[%s3075_s3] sm:$0xff]  }
 0x3cc   : > { %1075 = vadd.xlane.f32.xlu0 %v1074_v4  ;;  %1078 = vadd.xlane.f32.xlu1 %v1077_v5 }
 0x3d2   : > { %v2328_v6 = vpop.eup %2327 }
 0x3d3   : > { %v1088_v7 = vmul.f32 %v2328_v6, %v2312_v33 }
 0x3d5   : > { %v1096_v9 = vpack.c.bf16 %v1088_v7, %v1088_v7 }
 0x3d7   : > { %2108 = vmatmul.mubr.msk.bf16.vlgmr.msra.gmra.mxu1 %vm1007_vm4, %v1096_v9 }
 0x3d8   : > { %2118 = vmatpush3.bf16.msra.mxu1 %v1207_v10  ;;  %2119 = vmatprep.mubr.msk.bf16.mxu1 %vm2590_vm0, %v2589_v0 }
 0x3d9   : > { %2129 = vmatprep.subr.bf16.mxu1 %v2589_v0 }
 0x3dd   : > { %1393 = vrot.lane.b32.xlu1 %v2851_v25, %s2599_s30 }
 0x3e2   : > { %1441 = vrot.lane.b32.xlu0 %v2853_v26, %s2599_s30  ;;  %s2000_s30 = sshll.u32 %s2699_s29, 7 }
 0x418   : > { %v1061_v11 = vpop.xlane.xlu1 %1060 }
 0x419   : > { %2329 = vrcp.f32 %v1061_v11 }
 0x41c   : > { %v1064_v12 = vpop.xlane.xlu0 %1063  ;;  %v1298_v23 = vpop.permute.xlu1 %1297 }
 0x41d   : > { %2331 = vrcp.f32 %v1064_v12  ;;  %v1303_v26 = vsel %vm1109_vm3, %v1298_v23, 0 }
 0x420   : > { %v1346_v24 = vpop.permute.xlu0 %1345 }
 0x421   : > { %v1351_v37 = vsel %vm1109_vm3, %v1346_v24, 0 }
 0x426   : > { %v2330_v13 = vpop.eup %2329 }
 0x427   : > { %v1089_v14 = vmul.f32 %v2330_v13, %v2314_v18 }
 0x429   : > { %v1097_v15 = vpack.c.bf16 %v1089_v14, %v1089_v14 }
 0x42a   : > { %v2332_v16 = vpop.eup %2331 }
 0x42b   : > { %2114 = vmatmul.mubr.msk.bf16.vlgmr.msra.gmra.mxu0 %vm1007_vm4, %v1097_v15  ;;  %v1090_v20 = vmul.f32 %v2332_v16, %v2923_v17 }
 0x42c   : > { %2124 = vmatpush3.bf16.msra.mxu0 %v1255_v19  ;;  %2125 = vmatprep.mubr.msk.bf16.mxu0 %vm2590_vm0, %v2589_v0 }
 0x42d   : > { %v1098_v25 = vpack.c.bf16 %v1090_v20, %v1090_v20  ;;  %2135 = vmatprep.subr.bf16.mxu0 %v2589_v0 }
 0x42f   : > { %2120 = vmatmul.mubr.msk.bf16.vlgmr.msra.gmra.mxu1 %vm1007_vm4, %v1098_v25 }
 0x430   : > { %2130 = vmatpush3.bf16.msra.mxu1 %v1303_v26  ;;  %2131 = vmatprep.mubr.msk.bf16.mxu1 %vm2590_vm0, %v2589_v0 }
 0x431   : > { %2141 = vmatprep.subr.bf16.mxu1 %v2589_v0 }
 0x44d   : > { %v1067_v27 = vpop.xlane.xlu1 %1066 }
 0x44e   : > { %2333 = vrcp.f32 %v1067_v27 }
 0x451   : > { %v1070_v28 = vpop.xlane.xlu0 %1069  ;;  %v1073_v29 = vpop.xlane.xlu1 %1072 }
 0x452   : > { %2335 = vrcp.f32 %v1070_v28 }
 0x453   : > { %2337 = vrcp.f32 %v1073_v29 }
 0x455   : > { %v1076_v30 = vpop.xlane.xlu0 %1075  ;;  %v1079_v31 = vpop.xlane.xlu1 %1078 }
 0x456   : > { %2339 = vrcp.f32 %v1076_v30 }
 0x457   : > { %2341 = vrcp.f32 %v1079_v31 }
 0x459   : > { %v1394_v39 = vpop.permute.xlu1 %1393  ;;  %v1442_v42 = vpop.permute.xlu0 %1441 }
 0x45a   : > { %v1399_v17 = vsel %vm1109_vm3, %v1394_v39, 0  ;;  %v1447_v46 = vsel %vm1109_vm3, %v1442_v42, 0  ;;  %v1981_v39 = vld [vmem:[#allocation5] ss:$0 sm:$0xff] }
 0x45b   : > { %v2334_v32 = vpop.eup %2333 }
 0x45c   : > { %v1091_v33 = vmul.f32 %v2334_v32, %v2318_v22 }
 0x45e   : > { %v1099_v34 = vpack.c.bf16 %v1091_v33, %v1091_v33 }
 0x45f   : > { %v2336_v35 = vpop.eup %2335 }
 0x460   : > { %v2338_v36 = vpop.eup %2337  ;;  %2126 = vmatmul.mubr.msk.bf16.vlgmr.msra.gmra.mxu0 %vm1007_vm4, %v1099_v34  ;;  %v1092_v38 = vmul.f32 %v2336_v35, %v2931_v58 }
 0x461   : > { %2136 = vmatpush3.bf16.msra.mxu0 %v1351_v37  ;;  %2137 = vmatprep.mubr.msk.bf16.mxu0 %vm2590_vm0, %v2589_v0  ;;  %v1093_v18 = vmul.f32 %v2338_v36, %v2934_v60  ;;  %v2303_v60 = vld [vmem:[%s3075_s3 + $0x8] sm:$0xff]  }
 0x462   : > { %v1100_v40 = vpack.c.bf16 %v1092_v38, %v1092_v38  ;;  %2147 = vmatprep.subr.bf16.mxu0 %v2589_v0 }
 0x463   : > { %v2340_v41 = vpop.eup %2339  ;;  %v1101_v43 = vpack.c.bf16 %v1093_v18, %v1093_v18 }
 0x464   : > { %2132 = vmatmul.mubr.msk.bf16.vlgmr.msra.gmra.mxu1 %vm1007_vm4, %v1100_v40  ;;  %v1094_v44 = vmul.f32 %v2340_v41, %v2936_v62  ;;  %v2342_v45 = vpop.eup %2341 }
 0x465   : > { %2142 = vmatpush3.bf16.msra.mxu1 %v1399_v17  ;;  %2143 = vmatprep.mubr.msk.bf16.mxu1 %vm2590_vm0, %v2589_v0  ;;  %v1095_v48 = vmul.f32 %v2342_v45, %v2942_v2 }
 0x466   : > { %2153 = vmatprep.subr.bf16.mxu1 %v2589_v0  ;;  %v1102_v47 = vpack.c.bf16 %v1094_v44, %v1094_v44 }
 0x467   : > { %v1103_v49 = vpack.c.bf16 %v1095_v48, %v1095_v48 }
 0x468   : > { %2138 = vmatmul.mubr.msk.bf16.vlgmr.msra.gmra.mxu0 %vm1007_vm4, %v1101_v43 }
 0x469   : > { %2148 = vmatpush3.bf16.msra.mxu0 %v1447_v46  ;;  %2149 = vmatprep.mubr.msk.bf16.mxu0 %vm2590_vm0, %v2589_v0 }
 0x46a   : > { %2161 = vmatprep.subr.bf16.mxu0 %v2589_v0 }
 0x46c   : > { %2144 = vmatmul.mubr.msk.bf16.vlgmr.msra.gmra.mxu1 %vm1007_vm4, %v1102_v47 }
 0x46d   : > { %2157 = vmatprep.mubr.msk.bf16.mxu1 %vm2590_vm0, %v2589_v0  ;;  %2154 = vmatpush3.bf16.msra.mxu1 %v2303_v60 }
 0x46e   : > { %2155 = vmatprep.subr.bf16.mxu1 %v2589_v0 }
 0x470   : > { %2150 = vmatmul.mubr.msk.bf16.vlgmr.msra.gmra.mxu0 %vm1007_vm4, %v1103_v49 }
 0x471   : > { %2165 = vmatprep.mubr.msk.bf16.mxu0 %vm2590_vm0, %v2589_v0  ;;  %2156 = vmatpush3.bf16.msra.mxu1 %v2304_v63  ;;  %v1987_v63 = vld [vmem:[#allocation11] ss:$0 sm:$0xff] }
 0x472   : > { %2169 = vmatprep.subr.bf16.mxu1 %v2589_v0 }
 0x497   : > { %v1147_v50 = vpop.f32.mrf.mxu1 }
 0x499   : > { %v2109_v51 = vpop.f32.mrf.mxu1 }
 0x49a   : > { %v2306_v51 = vld [vmem:[#allocation10] sm:$0xff]  }
 0x49b   : > { %v1150_v52 = vpop.f32.mrf.mxu1 }
 0x49c   : > { %v2308_v52 = vld [vmem:[%s3081_s9 + $0x10] sm:$0xff]  }
 0x49d   : > { %v2110_v53 = vpop.f32.mrf.mxu1 }
 0x4eb   : > { %v1195_v54 = vpop.f32.mrf.mxu0 }
 0x4ec   : > { %1490 = vrot.lane.b32.xlu1 %v1195_v54, %s2600_s23 }
 0x4ed   : > { %v2115_v55 = vpop.f32.mrf.mxu0 }
 0x4ef   : > { %v1198_v56 = vpop.f32.mrf.mxu0  ;;  %v1243_v21 = vpop.f32.mrf.mxu1 }
 0x4f0   : > { %1494 = vrot.lane.b32.xlu0 %v1243_v21, %s2601_s4  ;;  %v1985_v21 = vld [vmem:[#allocation7] ss:$0 sm:$0xff] }
 0x4f1   : > { %v2116_v22 = vpop.f32.mrf.mxu0  ;;  %v2121_v57 = vpop.f32.mrf.mxu1 }
 0x4f2   : > { %v1986_v57 = vld [vmem:[#allocation8] ss:$0 sm:$0xff] }
 0x4f3   : > { %v1246_v58 = vpop.f32.mrf.mxu1 }
 0x4f5   : > { %v2122_v59 = vpop.f32.mrf.mxu1 }
 0x520   : > { %v1291_v61 = vpop.f32.mrf.mxu0 }
 0x521   : > { %1498 = vrot.lane.b32.xlu1 %v1291_v61, %s2602_s21  ;;  %v2309_v61 = vld [vmem:[%s3081_s9 + $0x8] sm:$0xff]   ;;  %s1822_s21 = scalar_lea.hbm %s3085_s13, %s2000_s30 }
 0x522   : > { %v2127_v62 = vpop.f32.mrf.mxu0 }
 0x523   : > { %v2310_v62 = vld [vmem:[%s3081_s9] sm:$0xff]  }
 0x524   : > { %v1294_v1 = vpop.f32.mrf.mxu0  ;;  %v1339_v2 = vpop.f32.mrf.mxu1 }
 0x525   : > { %1502 = vrot.lane.b32.xlu0 %v1339_v2, %s2603_s14  ;;  %s507_s14 = sand.u32 1, %s2571_s26  }
 0x526   : > { %v2128_v4 = vpop.f32.mrf.mxu0  ;;  %v2133_v5 = vpop.f32.mrf.mxu1  ;;  %s1811_s15 = scalar_lea.sflag [#allocation4], %s507_s14 }
 0x528   : > { %v1342_v6 = vpop.f32.mrf.mxu1  ;;  %v1387_v7 = vpop.f32.mrf.mxu0 }
 0x529   : > { %1506 = vrot.lane.b32.xlu1 %v1387_v7, %s2604_s16  ;;  %s1959_s16 = sshll.u32 %s507_s14, 3 }
 0x52a   : > { %v2134_v8 = vpop.f32.mrf.mxu1  ;;  %v2139_v9 = vpop.f32.mrf.mxu0  ;;  %s509_s23 = scalar_lea.vmem [#allocation13], %s1959_s16 }
 0x52b   : > { %v1991_v9 = vld [vmem:[%s3082_s10] ss:$0 sm:$0xff]  ;;  %s1824_s4 = sshll.u32 %s509_s23, 4  ;;  %s1825_s4 = int_to_ptr.vmem [resolvable:$true] %s1824_s4 }
 0x52c   : > { %v1390_v10 = vpop.f32.mrf.mxu0  ;;  %v1435_v11 = vpop.f32.mrf.mxu1  ;;  %s2503_s27 = scalar_lea.vmem %s1825_s4, 128 }
 0x52d   : > { %1510 = vrot.lane.b32.xlu0 %v1435_v11, %s2605_s19  ;;  %p2504_p2 = scmp.ne.s32.totalorder %s1825_s4, %s2503_s27  ;;  %s2607_s19 = smov [#allocation13]  }
 0x52e   : > { %v2140_v12 = vpop.f32.mrf.mxu0  ;;  %v2145_v13 = vpop.f32.mrf.mxu1 }
 0x52f   : > { %p2505_p3 = pnand %p2504_p2, %p3115_p9 }
 0x530   : > { %v1438_v14 = vpop.f32.mrf.mxu1  ;;  %v1483_v15 = vpop.f32.mrf.mxu0 }
 0x531   : > { %1514 = vrot.lane.b32.xlu1 %v1483_v15, %s2606_s2  ;;  %p2506_p5 = pneg %p2505_p3  ;;  %s2507_s2 = sshll.u32 %s2607_s19, 4  ;;  %s2508_s2 = int_to_ptr.vmem [resolvable:$false] %s2507_s2 }
 0x532   : > { %v2146_v16 = vpop.f32.mrf.mxu1  ;;  %v2151_v19 = vpop.f32.mrf.mxu0  ;;  %s2509_s29 = scalar_lea.vmem %s2508_s2, 256  ;;  %p2510_p6 = scmp.lt.s32.totalorder %s1825_s4, %s2508_s2 }
 0x533   : > { %p2511_p10 = scmp.lt.s32.totalorder %s2509_s29, %s2503_s27 }
 0x534   : > { %v1486_v20 = vpop.f32.mrf.mxu0 }
 0x535   : > { %p2512_p13 = por %p2511_p10, %p2510_p6 }
 0x536   : > { %v2152_v23 = vpop.f32.mrf.mxu0 }
 0x537   : > { %p2513_p4 = pnand %p2512_p13, %p2506_p5 }
 0x55e   : > { %v1491_v25 = vpop.permute.xlu1 %1490 }
 0x55f   : > { %v1517_v28 = vsel %vm617_vm2, %v1147_v50, %v1491_v25  ;;  %v2305_v50 = vld [vmem:[#allocation10 + $0x8] sm:$0xff]  }
 0x560   : > { %2162 = vmatpush3.bf16.msra.mxu0 %v2305_v50 }
 0x561   : > { %2163 = vmatprep.subr.bf16.mxu0 %v2589_v0 }
 0x562   : > { %v1495_v26 = vpop.permute.xlu0 %1494 }
 0x563   : > { %v1518_v29 = vsel %vm1007_vm4, %v1517_v28, %v1495_v26 }
 0x564   : > { %2164 = vmatpush3.bf16.msra.mxu0 %v2306_v51 }
 0x593   : > { %v1499_v24 = vpop.permute.xlu1 %1498 }
 0x594   : > { %v1520_v31 = vsel %vm1519_vm5, %v1518_v29, %v1499_v24  ;;  %v1997_v29 = vld [vmem:[%s3083_s11] ss:$0 sm:$0xff] }
 0x597   : > { %v1503_v27 = vpop.permute.xlu0 %1502 }
 0x598   : > { %v1522_v33 = vsel %vm1521_vm6, %v1520_v31, %v1503_v27  ;;  %v1998_v31 = vld [vmem:[%s3084_s12] ss:$0 sm:$0xff] }
 0x59b   : > { %v1507_v30 = vpop.permute.xlu1 %1506 }
 0x59c   : > { %v1524_v34 = vsel %vm1523_vm7, %v1522_v33, %v1507_v30 }
 0x59f   : > { %v1511_v32 = vpop.permute.xlu0 %1510 }
 0x5a0   : > { %v1526_v35 = vsel %vm1525_vm8, %v1524_v34, %v1511_v32 }
 0x5a3   : > { %v1515_v36 = vpop.permute.xlu1 %1514 }
 0x5a4   : > { %v1528_v37 = vsel %vm1527_vm9, %v1526_v35, %v1515_v36 }
 0x5a5   : > { %v1529_v38 = vpack.c.bf16 %v1528_v37, %v1528_v37 }
 0x5a7   : > { %2158 = vmatmul.mubr.msk.bf16.vlgmr.msra.gmra.mxu1 %vm540_vm1, %v1529_v38 }
 0x5a8   : > { %2177 = vmatprep.mubr.msk.bf16.mxu1 %vm2590_vm0, %v2589_v0 }
 0x667   : > { %v1590_v40 = vpop.f32.mrf.mxu1 }
 0x668   : > { %v1591_v18 = vadd.f32 %v1981_v39, %v1590_v40 }
 0x669   : > { %v2159_v41 = vpop.f32.mrf.mxu1 }
 0x66a   : > { %v1596_v17 = vadd.f32 %v1591_v18, %v2830_v3  ;;  %v2307_v3 = vld [vmem:[%s3081_s9 + $0x18] sm:$0xff]  }
 0x66b   : > { %v1593_v42 = vpop.f32.mrf.mxu1  ;;  %2170 = vmatpush3.bf16.msra.mxu1 %v2307_v3 }
 0x66c   : > { %v1597_v43 = vsel %vm540_vm1, %v1596_v17, 0.0  ;;  %2171 = vmatprep.subr.bf16.mxu1 %v2589_v0 }
 0x66d   : > { %1598 = vadd.xlane.f32.xlu0 %v1597_v43  ;;  %v2160_v44 = vpop.f32.mrf.mxu1 }
 0x66f   : > { %2172 = vmatpush3.bf16.msra.mxu1 %v2308_v52 }
 0x670   : > { %2173 = vmatprep.subr.bf16.mxu1 %v2589_v0 }
 0x673   : > { %2174 = vmatpush3.bf16.msra.mxu1 %v2309_v61 }
 0x674   : > { %2175 = vmatprep.subr.bf16.mxu1 %v2589_v0 }
 0x677   : > { %2176 = vmatpush3.bf16.msra.mxu1 %v2310_v62 }
 0x6f6   : > { %v1599_v45 = vpop.xlane.xlu0 %1598 }
 0x6f7   : > { %v1601_v46 = vmul.f32 0.03125, %v1599_v45 }
 0x6f9   : > { %v1602_v47 = vsub.f32 %v1596_v17, %v1601_v46 }
 0x6fb   : > { %v1603_v48 = vmul.f32 %v1602_v47, %v1602_v47 }
 0x6fd   : > { %v1604_v49 = vsel %vm540_vm1, %v1603_v48, 0.0 }
 0x6fe   : > { %1605 = vadd.xlane.f32.xlu1 %v1604_v49 }
 0x787   : > { %v1606_v53 = vpop.xlane.xlu1 %1605 }
 0x788   : > { %v1607_v54 = vmul.f32 0.03125, %v1606_v53 }
 0x78a   : > { %v1608_v55 = vadd.f32 1e-05, %v1607_v54 }
 0x78c   : > { %2343 = vrsqrt.f32 %v1608_v55 }
 0x799   : > { %v2344_v56 = vpop.eup %2343 }
 0x79a   : > { %v1610_v22 = vmul.f32 %v2344_v56, %v1602_v47 }
 0x79c   : > { %v1618_v58 = vmul.f32 %v1985_v21, %v1610_v22 }
 0x79e   : > { %v1626_v59 = vadd.f32 %v1986_v57, %v1618_v58 }
 0x7a0   : > { %v1627_v60 = vpack.c.bf16 %v1626_v59, %v1626_v59 }
 0x7a2   : > { %2166 = vmatmul.mubr.msk.bf16.vlgmr.msra.gmra.mxu0 %vm540_vm1, %v1627_v60 }
 0x862   : > { %v1688_v1 = vpop.f32.mrf.mxu0 }
 0x863   : > { %v1689_v2 = vadd.f32 %v1987_v63, %v1688_v1 }
 0x864   : > { %v2167_v4 = vpop.f32.mrf.mxu0 }
 0x865   : > { %v1694_v5 = vmax.f32 %v1689_v2, 0.0 }
 0x866   : > { %v1691_v6 = vpop.f32.mrf.mxu0 }
 0x867   : > { %v1695_v7 = vpack.c.bf16 %v1694_v5, %v1694_v5 }
 0x868   : > { %v2168_v8 = vpop.f32.mrf.mxu0 }
 0x869   : > { %2178 = vmatmul.mubr.msk.bf16.vlgmr.msra.gmra.mxu1 %vm1735_vm10, %v1695_v7 }
 0x929   : > { %v1773_v0 = vpop.f32.mrf.mxu1 }
 0x92a   : > { %v1774_v10 = vadd.f32 %v1991_v9, %v1773_v0 }
 0x92b   : > { %v2179_v11 = vpop.f32.mrf.mxu1 }
 0x92c   : > { %v1779_v12 = vadd.f32 %v1774_v10, %v1626_v59 }
 0x92d   : > { %v1776_v13 = vpop.f32.mrf.mxu1 }
 0x92e   : > { %v1780_v14 = vsel %vm540_vm1, %v1779_v12, 0.0 }
 0x92f   : > { %1781 = vadd.xlane.f32.xlu0 %v1780_v14  ;;  %v2180_v15 = vpop.f32.mrf.mxu1 }
 0x9b8   : > { %v1782_v16 = vpop.xlane.xlu0 %1781 }
 0x9b9   : > { %v1783_v19 = vmul.f32 0.03125, %v1782_v16 }
 0x9bb   : > { %v1784_v20 = vsub.f32 %v1779_v12, %v1783_v19 }
 0x9bd   : > { %v1785_v23 = vmul.f32 %v1784_v20, %v1784_v20 }
 0x9bf   : > { %v1786_v25 = vsel %vm540_vm1, %v1785_v23, 0.0 }
 0x9c0   : > { %1787 = vadd.xlane.f32.xlu0 %v1786_v25 }
 0xa49   : > { %v1788_v26 = vpop.xlane.xlu0 %1787 }
 0xa4a   : > { %v1789_v24 = vmul.f32 0.03125, %v1788_v26 }
 0xa4c   : > { %v1790_v27 = vadd.f32 1e-05, %v1789_v24 }
 0xa4e   : > { %2345 = vrsqrt.f32 %v1790_v27 }
 0xa5b   : > { %v2346_v28 = vpop.eup %2345 }
 0xa5c   : > { %v1792_v30 = vmul.f32 %v2346_v28, %v1784_v20 }
 0xa5e   : > { %v1800_v32 = vmul.f32 %v1997_v29, %v1792_v30 }
 0xa60   : > { %v1808_v33 = vadd.f32 %v1998_v31, %v1800_v32 }
 0xa62   : > { %1809 = vst.msk [vmem:[%s509_s23] sm:$0xff] %vm540_vm1, %v1808_v33 }
 0xa63   : > { %2516 = shalt.err (!%p2513_p4)
}
 0xa64   : > { %s2517_s16 = scalar_lea.hbm %s1822_s21, 128  ;;  %s2521_s20 = scalar_lea.hbm %s3085_s13, 256 }
 0xa65   : > { %p2518_p7 = scmp.ne.s32.totalorder %s1822_s21, %s2517_s16  ;;  %p2522_p11 = scmp.lt.s32.totalorder %s1822_s21, %s3085_s13 }
 0xa66   : > { %p2523_p0 = scmp.lt.s32.totalorder %s2521_s20, %s2517_s16 }
 0xa67   : > { %p2519_p8 = pnand %p2518_p7, %p3115_p9 }
 0xa68   : > { %p2524_p1 = por %p2523_p0, %p2522_p11 }
 0xa69   : > { %p2520_p12 = pneg %p2519_p8 }
 0xa6b   : > { %p2525_p2 = pnand %p2524_p1, %p2520_p12 }
 0xa6d   : > { %2528 = shalt.err (!%p2525_p2)
}
 0xa6e   : > { %2205 = dma.vmem_to_hbm [thread:$0]  (%p3115_p9), %s1825_s4, 128, %s1822_s21, %s1811_s15  }
 0xa6f PF: > { %s3116_s22 = sld [smem:[#allocation22_spill]]  ;;  %p2242_p3 = scmp.ge.s32.totalorder %s2579_s28, 2 }
 0xa70   : > { %s1836_s24 = sand.u32 1, %s2567_s25  }
 0xa71   : > { %s1837_s27 = scalar_lea.sflag [#allocation4], %s1836_s24 }
 0xa75   : > { %p3117_p5 = scmp.ne.s32.totalorder %s3116_s22, 0 }
 0xa77   : > { %p2227_p6 = pnand %p2242_p3, %p3117_p5 }
 0xa79   : > { %p2228_p10 = pneg %p2227_p6 }
 0xa7b   : > { %2562 = dma.done.wait (%p2228_p10), %s1837_s27, 128  }
 0xa7c   : > { %2564 = vsyncadd (%p2228_p10), %s1837_s27, 4294967168  ;;  %s3118_s28 = sld [smem:[#allocation20_spill]]  ;;  %s3121_s25 = smov %s2571_s26 }
 0xa7d   : > { %s3119_s19 = sld [smem:[#allocation19_spill]] }
 0xa7e   : > { %s3120_s27 = sld [smem:[#allocation21_spill]] }
 0xa82   : > { %p27_p13 = scmp.ge.s32.totalorder %s3118_s28, 4  }
 0xa83   : > { %s3122_s26 = smov %s3119_s19 }
 0xa84   :  { %29 = sbr.rel (!%p27_p13) target bundleno = 10 (0xa), region = 132 }
 0xa89   :  { %1842 = vsyncpa [#allocation3], 1 }
 0xa8a   :  { %1844 = vsyncpa [#allocation3 + $0x1], 1 }
 0xa8b   :  { %1845 = vsyncpa [#allocation6], 1 }
 0xa8c   :  { %1846 = vsyncpa [#allocation9], 1 }
 0xa8d   :  { %1847 = vsyncpa [#allocation12], 1 }
 0xa8e   :  { %1848 = vsyncpa [#allocation4], 1 }
 0xa8f   :  { %1850 = vsyncpa [#allocation4 + $0x1], 1 }

</bundles_post_ra>
